<compile_context>
chip_gen: v5e
topology: v5e:2x2
jax: 0.10.0
libtpu: 0.0.40
codegen_flags: <defaults>
</compile_context>

<pallas_src>
import math

import jax
import jax.numpy as jnp
from jax.experimental import pallas as pl
from jax.experimental.pallas import tpu as pltpu


def gcn_gwnet_forward(x_nchw, supports, conv_w, conv_b, *, order=2, tile_b=1024,
                      compute_dtype=None, vmem_budget_bytes=28 * 2**20):
    """x_nchw: (N, C, V, L); supports: list of (V, V); conv_w: (Cout, (order*S+1)*C, 1, 1)."""
    N, C, V, L = x_nchw.shape
    S = len(supports)
    NB = order * S + 1
    Cout = conv_w.shape[0]
    assert conv_w.shape == (Cout, NB * C, 1, 1), conv_w.shape

    out_dtype = x_nchw.dtype
    cdtype = jnp.dtype(compute_dtype) if compute_dtype is not None else jnp.dtype(out_dtype)
    csize = cdtype.itemsize
    osize = jnp.dtype(out_dtype).itemsize

    LANE, SUB = 128, 8

    # Smallest group of (n,l) slices whose channel lanes tile the 128-lane vreg.
    def _min_ti(c):
        return LANE // math.gcd(c, LANE)

    ti_c, ti_o = _min_ti(C), _min_ti(Cout)
    TI = ti_c * ti_o // math.gcd(ti_c, ti_o)
    TIC, TIO = TI * C, TI * Cout                      # both multiples of 128

    B = N * L
    Vp = ((V + SUB - 1) // SUB) * SUB                 # pad nodes to sublane multiple
    Bp_min = ((B + TI - 1) // TI) * TI                # pad time to TI granularity

    # --- VMEM-budgeted batch tile (per-unit-TB streamed bytes are tiny, so go big) ---
    per_tb = Vp * C * csize * 2 + Vp * Cout * osize * 2 + NB * Vp * C * csize
    const = (2 * (NB * Vp * Vp + NB * TIC * TIO) * csize + 2 * TIO * 4
             + Vp * NB * TIC * csize)
    tb_cap = max(TI, ((max(vmem_budget_bytes - const, per_tb)) // per_tb) // TI * TI)
    TB = max(TI, (min(tile_b, tb_cap, Bp_min) // TI) * TI)
    Bp = ((B + TB - 1) // TB) * TB
    G = TB // TI
    need = per_tb * TB + const
    vmem_limit = int(min(max(2 * need, 32 << 20), 56 << 20))

    # ---- layout plumbing (wrapper / XLA side, done once) ----
    # lanes of x_2d are ordered (t, c) with c minor; t = n*L + l; rows are nodes v.
    x_2d = jnp.transpose(x_nchw, (2, 0, 3, 1)).reshape(V, B * C).astype(cdtype)
    x_2d = jnp.pad(x_2d, ((0, Vp - V), (0, (Bp - B) * C)))            # (Vp, Bp*C)

    # Stacked propagation operator P = [I; A1^T; (A1^T)^2; A2^T; ...]  (NB*Vp, Vp).
    blocks = [jnp.eye(V, dtype=jnp.float32)]
    for a in supports:
        at = jnp.transpose(a).astype(jnp.float32)
        p = at
        blocks.append(p)
        for _ in range(2, order + 1):
            p = at @ p
            blocks.append(p)
    P = jnp.concatenate(
        [jnp.pad(b, ((0, Vp - V), (0, Vp - V))) for b in blocks], axis=0).astype(cdtype)

    # 1x1-conv weights as a single K-stacked block-diagonal matrix (NB*TIC, TIO):
    # rows [k*TIC:(k+1)*TIC] = kron(I_TI, W_k^T) with W_k = conv_w[:, k*C:(k+1)*C].
    w2 = conv_w[:, :, 0, 0].astype(jnp.float32)                        # (Cout, NB*C)
    eye_ti = jnp.eye(TI, dtype=jnp.float32)
    wbig = jnp.concatenate(
        [jnp.kron(eye_ti, jnp.transpose(w2[:, k * C:(k + 1) * C])) for k in range(NB)],
        axis=0).astype(cdtype)                                         # (NB*TIC, TIO)
    bias = jnp.tile(conv_b.astype(jnp.float32), TI).reshape(1, TIO)    # f32, tiny

    def kernel(x_ref, p_ref, w_ref, b_ref, o_ref, hprop_ref, hall_ref):
        # x_ref    : (Vp, TB*C)      streamed tile, lanes = (t, c)
        # p_ref    : (NB*Vp, Vp)     resident stacked propagation operator
        # w_ref    : (NB*TIC, TIO)   resident K-stacked block-diag conv weight
        # b_ref    : (1, TIO)        resident tiled bias (f32)
        # o_ref    : (Vp, TB*Cout)   lane-dense output tile, lanes = (t, c_out)
        # hprop_ref: (NB*Vp, TB*C)   VMEM scratch: all propagated blocks for the tile
        # hall_ref : (Vp, NB*TIC)    VMEM scratch: per-sub-tile concat along lanes
        #
        # 1) One matmul produces every propagated block for the whole batch tile.
        hprop_ref[...] = jnp.dot(p_ref[...], x_ref[...],
                                 preferred_element_type=jnp.float32).astype(hprop_ref.dtype)

        # Hoisted: JAX does not CSE broadcast_in_dim inside the loop.
        bias_b = jnp.broadcast_to(b_ref[...], (Vp, TIO)).astype(jnp.float32)

        # 2) Per TI-wide sub-tile: scatter the NB blocks to adjacent lane offsets
        #    (pure tile copies) and run ONE long-K conv matmul (Vp, NB*TIC)@(NB*TIC, TIO).
        def body(j, carry):
            cj = pl.multiple_of(j * TIC, TIC)
            oj = pl.multiple_of(j * TIO, TIO)
            for k in range(NB):        # static, small (NB = order*S+1)
                hall_ref[:, k * TIC:(k + 1) * TIC] = hprop_ref[k * Vp:(k + 1) * Vp,
                                                               pl.ds(cj, TIC)]
            acc = jnp.dot(hall_ref[...], w_ref[...],
                          preferred_element_type=jnp.float32)
            # TODO(synk): F.dropout(training=True) would need pltpu.prng_* masking;
            # implemented in eval mode (identity), matching inference semantics.
            o_ref[:, pl.ds(oj, TIO)] = (acc + bias_b).astype(o_ref.dtype)
            return carry

        jax.lax.fori_loop(0, G, body, 0, unroll=(G if G <= 4 else 4))

    flops = 2 * (NB * Vp) * Vp * (Bp * C) + 2 * (Bp // TI) * Vp * (NB * TIC) * TIO
    bytes_accessed = int(csize * (Vp * Bp * C + NB * Vp * Vp + NB * TIC * TIO)
                         + osize * Vp * Bp * Cout + 4 * TIO)

    out2d = pl.pallas_call(
        kernel,
        out_shape=jax.ShapeDtypeStruct((Vp, Bp * Cout), out_dtype),
        grid_spec=pltpu.PrefetchScalarGridSpec(
            num_scalar_prefetch=0,
            grid=(Bp // TB,),
            in_specs=[
                pl.BlockSpec((Vp, TB * C), lambda i: (0, i)),           # streamed x tile
                pl.BlockSpec((NB * Vp, Vp), lambda i: (0, 0)),          # resident P
                pl.BlockSpec((NB * TIC, TIO), lambda i: (0, 0)),        # resident weights
                pl.BlockSpec((1, TIO), lambda i: (0, 0)),               # resident bias
            ],
            out_specs=pl.BlockSpec((Vp, TB * Cout), lambda i: (0, i)),
            scratch_shapes=[
                pltpu.VMEM((NB * Vp, TB * C), cdtype),                  # hprop
                pltpu.VMEM((Vp, NB * TIC), cdtype),                     # hall
            ],
        ),
        compiler_params=pltpu.CompilerParams(
            dimension_semantics=("parallel",),
            vmem_limit_bytes=vmem_limit),
        cost_estimate=pl.CostEstimate(
            flops=int(flops), transcendentals=0, bytes_accessed=bytes_accessed),
    )(x_2d, P, wbig, bias)

    out = out2d[:V, :B * Cout].reshape(V, N, L, Cout)
    return jnp.transpose(out, (1, 3, 0, 2))                            # (N, Cout, V, L)


def gcn_gwnet_reference(x, supports, conv_w, conv_b, order=2):
    """Pure-JAX mirror of the PyTorch forward (eval mode)."""
    out = [x]
    for a in supports:
        x1 = jnp.einsum('ncvl,vw->ncwl', x, a)
        out.append(x1)
        for _ in range(2, order + 1):
            x2 = jnp.einsum('ncvl,vw->ncwl', x1, a)
            out.append(x2)
            x1 = x2
    h = jnp.concatenate(out, axis=1)
    w = conv_w[:, :, 0, 0]
    return jnp.einsum('oc,ncvl->novl', w, h) + conv_b[None, :, None, None]


if __name__ == "__main__":
    key = jax.random.PRNGKey(0)
    N, C, V, L = 2, 32, 16, 8            # batch, channels (c_in=32), nodes, seq
    Cout = 32
    SUPPORT_LEN, ORDER = 3, 2
    Cbig = (ORDER * SUPPORT_LEN + 1) * C  # 7 * 32 = 224

    k1, k2, k3, k4 = jax.random.split(key, 4)
    x = jax.random.normal(k1, (N, C, V, L), dtype=jnp.float32)
    sup_keys = jax.random.split(k2, SUPPORT_LEN)
    supports = [
        jax.nn.softmax(jax.random.normal(k, (V, V), dtype=jnp.float32), axis=-1)
        for k in sup_keys
    ]
    conv_w = jax.random.normal(k3, (Cout, Cbig, 1, 1), dtype=jnp.float32) / (Cbig ** 0.5)
    conv_b = 0.1 * jax.random.normal(k4, (Cout,), dtype=jnp.float32)

    ref = gcn_gwnet_reference(x, supports, conv_w, conv_b, order=ORDER)

    # f32 operands (bit-accurate path)
    out = gcn_gwnet_forward(x, supports, conv_w, conv_b, order=ORDER, tile_b=1024)
    out = jax.block_until_ready(out)
    assert out.shape == (N, Cout, V, L)
    err = float(jnp.max(jnp.abs(out - ref)))
    assert err < 2e-4, f"f32 max abs err {err}"

    # bf16 operands (fast path: bf16 MXU operands, f32 accumulation, f32 output)
    out_bf = gcn_gwnet_forward(x, supports, conv_w, conv_b, order=ORDER, tile_b=1024,
                               compute_dtype=jnp.bfloat16)
    out_bf = jax.block_until_ready(out_bf)
    err_bf = float(jnp.max(jnp.abs(out_bf.astype(jnp.float32) - ref)))
    assert err_bf < 0.15, f"bf16 max abs err {err_bf}"

    print("KERNEL_OK")
</pallas_src>

<mosaic_0001>
module attributes {stable_mosaic.version = 11 : i64} {
  func.func @kernel(%arg0: i32, %arg1: memref<16x512xf32, #tpu.memory_space<vmem>>, %arg2: memref<112x16xf32, #tpu.memory_space<vmem>>, %arg3: memref<896x128xf32, #tpu.memory_space<vmem>>, %arg4: memref<1x128xf32, #tpu.memory_space<vmem>>, %arg5: memref<16x512xf32, #tpu.memory_space<vmem>>, %arg6: memref<112x512xf32, #tpu.memory_space<vmem>>, %arg7: memref<16x896xf32, #tpu.memory_space<vmem>>) attributes {dimension_semantics = [#tpu.dimension_semantics<parallel>], iteration_bounds = array<i64: 1>, scalar_prefetch = 0 : i64, scratch_operands = 2 : i64, tpu.core_type = #tpu.core_type<tc>, window_params = [{transform_indices = @transform_0, window_bounds = array<i64: 16, 512>}, {pipeline_mode = #tpu.pipeline_mode<synchronous>, transform_indices = @transform_1, window_bounds = array<i64: 112, 16>}, {pipeline_mode = #tpu.pipeline_mode<synchronous>, transform_indices = @transform_2, window_bounds = array<i64: 896, 128>}, {pipeline_mode = #tpu.pipeline_mode<synchronous>, transform_indices = @transform_3, window_bounds = array<i64: 1, 128>}, {transform_indices = @transform_4, window_bounds = array<i64: 16, 512>}]} {
    %c0 = arith.constant 0 : index
    %c0_0 = arith.constant 0 : index
    %0 = vector.load %arg2[%c0, %c0_0] : memref<112x16xf32, #tpu.memory_space<vmem>>, vector<112x16xf32>
    %c0_1 = arith.constant 0 : index
    %c0_2 = arith.constant 0 : index
    %1 = vector.load %arg1[%c0_1, %c0_2] : memref<16x512xf32, #tpu.memory_space<vmem>>, vector<16x512xf32>
    %cst = arith.constant dense<0.000000e+00> : vector<112x512xf32>
    %2 = tpu.matmul %0, %1, %cst {dimension_numbers = #tpu.dot_dimension_numbers<[1], [0], [0], [1], [0, 0, 1, 1], [], []>} : vector<112x16xf32>, vector<16x512xf32>, vector<112x512xf32> -> vector<112x512xf32>
    %c0_3 = arith.constant 0 : index
    %c0_4 = arith.constant 0 : index
    %3 = vector.load %arg6[%c0_3, %c0_4] : memref<112x512xf32, #tpu.memory_space<vmem>>, vector<112x512xf32>
    tpu.vector_store %arg6[%c0_3, %c0_4], %2 {strides = array<i32>} : memref<112x512xf32, #tpu.memory_space<vmem>>, vector<112x512xf32>,
    %c0_5 = arith.constant 0 : index
    %c0_6 = arith.constant 0 : index
    %4 = vector.load %arg4[%c0_5, %c0_6] : memref<1x128xf32, #tpu.memory_space<vmem>>, vector<1x128xf32>
    %5 = vector.shape_cast %4 : vector<1x128xf32> to vector<1x128xf32>
    %6 = vector.broadcast %5 : vector<1x128xf32> to vector<16x128xf32>
    %c0_i32 = arith.constant 0 : i32
    %c128_i32 = arith.constant 128 : i32
    %7 = arith.muli %c0_i32, %c128_i32 : i32
    %8 = tpu.assume_multiple %7, 128 : i32
    %c128_i32_7 = arith.constant 128 : i32
    %9 = arith.muli %c0_i32, %c128_i32_7 : i32
    %10 = tpu.assume_multiple %9, 128 : i32
    %c0_8 = arith.constant 0 : index
    %11 = arith.index_cast %8 : i32 to index
    %12 = vector.load %arg6[%c0_8, %11] : memref<112x512xf32, #tpu.memory_space<vmem>>, vector<16x128xf32>
    %c0_9 = arith.constant 0 : index
    %c0_10 = arith.constant 0 : index
    %13 = vector.load %arg7[%c0_9, %c0_10] : memref<16x896xf32, #tpu.memory_space<vmem>>, vector<16x128xf32>
    tpu.vector_store %arg7[%c0_9, %c0_10], %12 {strides = array<i32>} : memref<16x896xf32, #tpu.memory_space<vmem>>, vector<16x128xf32>,
    %c16 = arith.constant 16 : index
    %14 = arith.index_cast %8 : i32 to index
    %15 = vector.load %arg6[%c16, %14] : memref<112x512xf32, #tpu.memory_space<vmem>>, vector<16x128xf32>
    %c0_11 = arith.constant 0 : index
    %c128 = arith.constant 128 : index
    %16 = vector.load %arg7[%c0_11, %c128] : memref<16x896xf32, #tpu.memory_space<vmem>>, vector<16x128xf32>
    tpu.vector_store %arg7[%c0_11, %c128], %15 {strides = array<i32>} : memref<16x896xf32, #tpu.memory_space<vmem>>, vector<16x128xf32>,
    %c32 = arith.constant 32 : index
    %17 = arith.index_cast %8 : i32 to index
    %18 = vector.load %arg6[%c32, %17] : memref<112x512xf32, #tpu.memory_space<vmem>>, vector<16x128xf32>
    %c0_12 = arith.constant 0 : index
    %c256 = arith.constant 256 : index
    %19 = vector.load %arg7[%c0_12, %c256] : memref<16x896xf32, #tpu.memory_space<vmem>>, vector<16x128xf32>
    tpu.vector_store %arg7[%c0_12, %c256], %18 {strides = array<i32>} : memref<16x896xf32, #tpu.memory_space<vmem>>, vector<16x128xf32>,
    %c48 = arith.constant 48 : index
    %20 = arith.index_cast %8 : i32 to index
    %21 = vector.load %arg6[%c48, %20] : memref<112x512xf32, #tpu.memory_space<vmem>>, vector<16x128xf32>
    %c0_13 = arith.constant 0 : index
    %c384 = arith.constant 384 : index
    %22 = vector.load %arg7[%c0_13, %c384] : memref<16x896xf32, #tpu.memory_space<vmem>>, vector<16x128xf32>
    tpu.vector_store %arg7[%c0_13, %c384], %21 {strides = array<i32>} : memref<16x896xf32, #tpu.memory_space<vmem>>, vector<16x128xf32>,
    %c64 = arith.constant 64 : index
    %23 = arith.index_cast %8 : i32 to index
    %24 = vector.load %arg6[%c64, %23] : memref<112x512xf32, #tpu.memory_space<vmem>>, vector<16x128xf32>
    %c0_14 = arith.constant 0 : index
    %c512 = arith.constant 512 : index
    %25 = vector.load %arg7[%c0_14, %c512] : memref<16x896xf32, #tpu.memory_space<vmem>>, vector<16x128xf32>
    tpu.vector_store %arg7[%c0_14, %c512], %24 {strides = array<i32>} : memref<16x896xf32, #tpu.memory_space<vmem>>, vector<16x128xf32>,
    %c80 = arith.constant 80 : index
    %26 = arith.index_cast %8 : i32 to index
    %27 = vector.load %arg6[%c80, %26] : memref<112x512xf32, #tpu.memory_space<vmem>>, vector<16x128xf32>
    %c0_15 = arith.constant 0 : index
    %c640 = arith.constant 640 : index
    %28 = vector.load %arg7[%c0_15, %c640] : memref<16x896xf32, #tpu.memory_space<vmem>>, vector<16x128xf32>
    tpu.vector_store %arg7[%c0_15, %c640], %27 {strides = array<i32>} : memref<16x896xf32, #tpu.memory_space<vmem>>, vector<16x128xf32>,
    %c96 = arith.constant 96 : index
    %29 = arith.index_cast %8 : i32 to index
    %30 = vector.load %arg6[%c96, %29] : memref<112x512xf32, #tpu.memory_space<vmem>>, vector<16x128xf32>
    %c0_16 = arith.constant 0 : index
    %c768 = arith.constant 768 : index
    %31 = vector.load %arg7[%c0_16, %c768] : memref<16x896xf32, #tpu.memory_space<vmem>>, vector<16x128xf32>
    tpu.vector_store %arg7[%c0_16, %c768], %30 {strides = array<i32>} : memref<16x896xf32, #tpu.memory_space<vmem>>, vector<16x128xf32>,
    %c0_17 = arith.constant 0 : index
    %c0_18 = arith.constant 0 : index
    %32 = vector.load %arg7[%c0_17, %c0_18] : memref<16x896xf32, #tpu.memory_space<vmem>>, vector<16x896xf32>
    %c0_19 = arith.constant 0 : index
    %c0_20 = arith.constant 0 : index
    %33 = vector.load %arg3[%c0_19, %c0_20] : memref<896x128xf32, #tpu.memory_space<vmem>>, vector<896x128xf32>
    %cst_21 = arith.constant dense<0.000000e+00> : vector<16x128xf32>
    %34 = tpu.matmul %32, %33, %cst_21 {dimension_numbers = #tpu.dot_dimension_numbers<[1], [0], [0], [1], [0, 0, 1, 1], [], []>} : vector<16x896xf32>, vector<896x128xf32>, vector<16x128xf32> -> vector<16x128xf32>
    %35 = arith.addf %34, %6 : vector<16x128xf32>
    %c0_22 = arith.constant 0 : index
    %36 = arith.index_cast %10 : i32 to index
    %37 = vector.load %arg5[%c0_22, %36] : memref<16x512xf32, #tpu.memory_space<vmem>>, vector<16x128xf32>
    tpu.vector_store %arg5[%c0_22, %36], %35 {strides = array<i32>} : memref<16x512xf32, #tpu.memory_space<vmem>>, vector<16x128xf32>,
    %c1_i32 = arith.constant 1 : i32
    %c128_i32_23 = arith.constant 128 : i32
    %38 = arith.muli %c1_i32, %c128_i32_23 : i32
    %39 = tpu.assume_multiple %38, 128 : i32
    %c128_i32_24 = arith.constant 128 : i32
    %40 = arith.muli %c1_i32, %c128_i32_24 : i32
    %41 = tpu.assume_multiple %40, 128 : i32
    %c0_25 = arith.constant 0 : index
    %42 = arith.index_cast %39 : i32 to index
    %43 = vector.load %arg6[%c0_25, %42] : memref<112x512xf32, #tpu.memory_space<vmem>>, vector<16x128xf32>
    %c0_26 = arith.constant 0 : index
    %c0_27 = arith.constant 0 : index
    %44 = vector.load %arg7[%c0_26, %c0_27] : memref<16x896xf32, #tpu.memory_space<vmem>>, vector<16x128xf32>
    tpu.vector_store %arg7[%c0_26, %c0_27], %43 {strides = array<i32>} : memref<16x896xf32, #tpu.memory_space<vmem>>, vector<16x128xf32>,
    %c16_28 = arith.constant 16 : index
    %45 = arith.index_cast %39 : i32 to index
    %46 = vector.load %arg6[%c16_28, %45] : memref<112x512xf32, #tpu.memory_space<vmem>>, vector<16x128xf32>
    %c0_29 = arith.constant 0 : index
    %c128_30 = arith.constant 128 : index
    %47 = vector.load %arg7[%c0_29, %c128_30] : memref<16x896xf32, #tpu.memory_space<vmem>>, vector<16x128xf32>
    tpu.vector_store %arg7[%c0_29, %c128_30], %46 {strides = array<i32>} : memref<16x896xf32, #tpu.memory_space<vmem>>, vector<16x128xf32>,
    %c32_31 = arith.constant 32 : index
    %48 = arith.index_cast %39 : i32 to index
    %49 = vector.load %arg6[%c32_31, %48] : memref<112x512xf32, #tpu.memory_space<vmem>>, vector<16x128xf32>
    %c0_32 = arith.constant 0 : index
    %c256_33 = arith.constant 256 : index
    %50 = vector.load %arg7[%c0_32, %c256_33] : memref<16x896xf32, #tpu.memory_space<vmem>>, vector<16x128xf32>
    tpu.vector_store %arg7[%c0_32, %c256_33], %49 {strides = array<i32>} : memref<16x896xf32, #tpu.memory_space<vmem>>, vector<16x128xf32>,
    %c48_34 = arith.constant 48 : index
    %51 = arith.index_cast %39 : i32 to index
    %52 = vector.load %arg6[%c48_34, %51] : memref<112x512xf32, #tpu.memory_space<vmem>>, vector<16x128xf32>
    %c0_35 = arith.constant 0 : index
    %c384_36 = arith.constant 384 : index
    %53 = vector.load %arg7[%c0_35, %c384_36] : memref<16x896xf32, #tpu.memory_space<vmem>>, vector<16x128xf32>
    tpu.vector_store %arg7[%c0_35, %c384_36], %52 {strides = array<i32>} : memref<16x896xf32, #tpu.memory_space<vmem>>, vector<16x128xf32>,
    %c64_37 = arith.constant 64 : index
    %54 = arith.index_cast %39 : i32 to index
    %55 = vector.load %arg6[%c64_37, %54] : memref<112x512xf32, #tpu.memory_space<vmem>>, vector<16x128xf32>
    %c0_38 = arith.constant 0 : index
    %c512_39 = arith.constant 512 : index
    %56 = vector.load %arg7[%c0_38, %c512_39] : memref<16x896xf32, #tpu.memory_space<vmem>>, vector<16x128xf32>
    tpu.vector_store %arg7[%c0_38, %c512_39], %55 {strides = array<i32>} : memref<16x896xf32, #tpu.memory_space<vmem>>, vector<16x128xf32>,
    %c80_40 = arith.constant 80 : index
    %57 = arith.index_cast %39 : i32 to index
    %58 = vector.load %arg6[%c80_40, %57] : memref<112x512xf32, #tpu.memory_space<vmem>>, vector<16x128xf32>
    %c0_41 = arith.constant 0 : index
    %c640_42 = arith.constant 640 : index
    %59 = vector.load %arg7[%c0_41, %c640_42] : memref<16x896xf32, #tpu.memory_space<vmem>>, vector<16x128xf32>
    tpu.vector_store %arg7[%c0_41, %c640_42], %58 {strides = array<i32>} : memref<16x896xf32, #tpu.memory_space<vmem>>, vector<16x128xf32>,
    %c96_43 = arith.constant 96 : index
    %60 = arith.index_cast %39 : i32 to index
    %61 = vector.load %arg6[%c96_43, %60] : memref<112x512xf32, #tpu.memory_space<vmem>>, vector<16x128xf32>
    %c0_44 = arith.constant 0 : index
    %c768_45 = arith.constant 768 : index
    %62 = vector.load %arg7[%c0_44, %c768_45] : memref<16x896xf32, #tpu.memory_space<vmem>>, vector<16x128xf32>
    tpu.vector_store %arg7[%c0_44, %c768_45], %61 {strides = array<i32>} : memref<16x896xf32, #tpu.memory_space<vmem>>, vector<16x128xf32>,
    %c0_46 = arith.constant 0 : index
    %c0_47 = arith.constant 0 : index
    %63 = vector.load %arg7[%c0_46, %c0_47] : memref<16x896xf32, #tpu.memory_space<vmem>>, vector<16x896xf32>
    %c0_48 = arith.constant 0 : index
    %c0_49 = arith.constant 0 : index
    %64 = vector.load %arg3[%c0_48, %c0_49] : memref<896x128xf32, #tpu.memory_space<vmem>>, vector<896x128xf32>
    %cst_50 = arith.constant dense<0.000000e+00> : vector<16x128xf32>
    %65 = tpu.matmul %63, %64, %cst_50 {dimension_numbers = #tpu.dot_dimension_numbers<[1], [0], [0], [1], [0, 0, 1, 1], [], []>} : vector<16x896xf32>, vector<896x128xf32>, vector<16x128xf32> -> vector<16x128xf32>
    %66 = arith.addf %65, %6 : vector<16x128xf32>
    %c0_51 = arith.constant 0 : index
    %67 = arith.index_cast %41 : i32 to index
    %68 = vector.load %arg5[%c0_51, %67] : memref<16x512xf32, #tpu.memory_space<vmem>>, vector<16x128xf32>
    tpu.vector_store %arg5[%c0_51, %67], %66 {strides = array<i32>} : memref<16x512xf32, #tpu.memory_space<vmem>>, vector<16x128xf32>,
    %c2_i32 = arith.constant 2 : i32
    %c128_i32_52 = arith.constant 128 : i32
    %69 = arith.muli %c2_i32, %c128_i32_52 : i32
    %70 = tpu.assume_multiple %69, 128 : i32
    %c128_i32_53 = arith.constant 128 : i32
    %71 = arith.muli %c2_i32, %c128_i32_53 : i32
    %72 = tpu.assume_multiple %71, 128 : i32
    %c0_54 = arith.constant 0 : index
    %73 = arith.index_cast %70 : i32 to index
    %74 = vector.load %arg6[%c0_54, %73] : memref<112x512xf32, #tpu.memory_space<vmem>>, vector<16x128xf32>
    %c0_55 = arith.constant 0 : index
    %c0_56 = arith.constant 0 : index
    %75 = vector.load %arg7[%c0_55, %c0_56] : memref<16x896xf32, #tpu.memory_space<vmem>>, vector<16x128xf32>
    tpu.vector_store %arg7[%c0_55, %c0_56], %74 {strides = array<i32>} : memref<16x896xf32, #tpu.memory_space<vmem>>, vector<16x128xf32>,
    %c16_57 = arith.constant 16 : index
    %76 = arith.index_cast %70 : i32 to index
    %77 = vector.load %arg6[%c16_57, %76] : memref<112x512xf32, #tpu.memory_space<vmem>>, vector<16x128xf32>
    %c0_58 = arith.constant 0 : index
    %c128_59 = arith.constant 128 : index
    %78 = vector.load %arg7[%c0_58, %c128_59] : memref<16x896xf32, #tpu.memory_space<vmem>>, vector<16x128xf32>
    tpu.vector_store %arg7[%c0_58, %c128_59], %77 {strides = array<i32>} : memref<16x896xf32, #tpu.memory_space<vmem>>, vector<16x128xf32>,
    %c32_60 = arith.constant 32 : index
    %79 = arith.index_cast %70 : i32 to index
    %80 = vector.load %arg6[%c32_60, %79] : memref<112x512xf32, #tpu.memory_space<vmem>>, vector<16x128xf32>
    %c0_61 = arith.constant 0 : index
    %c256_62 = arith.constant 256 : index
    %81 = vector.load %arg7[%c0_61, %c256_62] : memref<16x896xf32, #tpu.memory_space<vmem>>, vector<16x128xf32>
    tpu.vector_store %arg7[%c0_61, %c256_62], %80 {strides = array<i32>} : memref<16x896xf32, #tpu.memory_space<vmem>>, vector<16x128xf32>,
    %c48_63 = arith.constant 48 : index
    %82 = arith.index_cast %70 : i32 to index
    %83 = vector.load %arg6[%c48_63, %82] : memref<112x512xf32, #tpu.memory_space<vmem>>, vector<16x128xf32>
    %c0_64 = arith.constant 0 : index
    %c384_65 = arith.constant 384 : index
    %84 = vector.load %arg7[%c0_64, %c384_65] : memref<16x896xf32, #tpu.memory_space<vmem>>, vector<16x128xf32>
    tpu.vector_store %arg7[%c0_64, %c384_65], %83 {strides = array<i32>} : memref<16x896xf32, #tpu.memory_space<vmem>>, vector<16x128xf32>,
    %c64_66 = arith.constant 64 : index
    %85 = arith.index_cast %70 : i32 to index
    %86 = vector.load %arg6[%c64_66, %85] : memref<112x512xf32, #tpu.memory_space<vmem>>, vector<16x128xf32>
    %c0_67 = arith.constant 0 : index
    %c512_68 = arith.constant 512 : index
    %87 = vector.load %arg7[%c0_67, %c512_68] : memref<16x896xf32, #tpu.memory_space<vmem>>, vector<16x128xf32>
    tpu.vector_store %arg7[%c0_67, %c512_68], %86 {strides = array<i32>} : memref<16x896xf32, #tpu.memory_space<vmem>>, vector<16x128xf32>,
    %c80_69 = arith.constant 80 : index
    %88 = arith.index_cast %70 : i32 to index
    %89 = vector.load %arg6[%c80_69, %88] : memref<112x512xf32, #tpu.memory_space<vmem>>, vector<16x128xf32>
    %c0_70 = arith.constant 0 : index
    %c640_71 = arith.constant 640 : index
    %90 = vector.load %arg7[%c0_70, %c640_71] : memref<16x896xf32, #tpu.memory_space<vmem>>, vector<16x128xf32>
    tpu.vector_store %arg7[%c0_70, %c640_71], %89 {strides = array<i32>} : memref<16x896xf32, #tpu.memory_space<vmem>>, vector<16x128xf32>,
    %c96_72 = arith.constant 96 : index
    %91 = arith.index_cast %70 : i32 to index
    %92 = vector.load %arg6[%c96_72, %91] : memref<112x512xf32, #tpu.memory_space<vmem>>, vector<16x128xf32>
    %c0_73 = arith.constant 0 : index
    %c768_74 = arith.constant 768 : index
    %93 = vector.load %arg7[%c0_73, %c768_74] : memref<16x896xf32, #tpu.memory_space<vmem>>, vector<16x128xf32>
    tpu.vector_store %arg7[%c0_73, %c768_74], %92 {strides = array<i32>} : memref<16x896xf32, #tpu.memory_space<vmem>>, vector<16x128xf32>,
    %c0_75 = arith.constant 0 : index
    %c0_76 = arith.constant 0 : index
    %94 = vector.load %arg7[%c0_75, %c0_76] : memref<16x896xf32, #tpu.memory_space<vmem>>, vector<16x896xf32>
    %c0_77 = arith.constant 0 : index
    %c0_78 = arith.constant 0 : index
    %95 = vector.load %arg3[%c0_77, %c0_78] : memref<896x128xf32, #tpu.memory_space<vmem>>, vector<896x128xf32>
    %cst_79 = arith.constant dense<0.000000e+00> : vector<16x128xf32>
    %96 = tpu.matmul %94, %95, %cst_79 {dimension_numbers = #tpu.dot_dimension_numbers<[1], [0], [0], [1], [0, 0, 1, 1], [], []>} : vector<16x896xf32>, vector<896x128xf32>, vector<16x128xf32> -> vector<16x128xf32>
    %97 = arith.addf %96, %6 : vector<16x128xf32>
    %c0_80 = arith.constant 0 : index
    %98 = arith.index_cast %72 : i32 to index
    %99 = vector.load %arg5[%c0_80, %98] : memref<16x512xf32, #tpu.memory_space<vmem>>, vector<16x128xf32>
    tpu.vector_store %arg5[%c0_80, %98], %97 {strides = array<i32>} : memref<16x512xf32, #tpu.memory_space<vmem>>, vector<16x128xf32>,
    %c3_i32 = arith.constant 3 : i32
    %c128_i32_81 = arith.constant 128 : i32
    %100 = arith.muli %c3_i32, %c128_i32_81 : i32
    %101 = tpu.assume_multiple %100, 128 : i32
    %c128_i32_82 = arith.constant 128 : i32
    %102 = arith.muli %c3_i32, %c128_i32_82 : i32
    %103 = tpu.assume_multiple %102, 128 : i32
    %c0_83 = arith.constant 0 : index
    %104 = arith.index_cast %101 : i32 to index
    %105 = vector.load %arg6[%c0_83, %104] : memref<112x512xf32, #tpu.memory_space<vmem>>, vector<16x128xf32>
    %c0_84 = arith.constant 0 : index
    %c0_85 = arith.constant 0 : index
    %106 = vector.load %arg7[%c0_84, %c0_85] : memref<16x896xf32, #tpu.memory_space<vmem>>, vector<16x128xf32>
    tpu.vector_store %arg7[%c0_84, %c0_85], %105 {strides = array<i32>} : memref<16x896xf32, #tpu.memory_space<vmem>>, vector<16x128xf32>,
    %c16_86 = arith.constant 16 : index
    %107 = arith.index_cast %101 : i32 to index
    %108 = vector.load %arg6[%c16_86, %107] : memref<112x512xf32, #tpu.memory_space<vmem>>, vector<16x128xf32>
    %c0_87 = arith.constant 0 : index
    %c128_88 = arith.constant 128 : index
    %109 = vector.load %arg7[%c0_87, %c128_88] : memref<16x896xf32, #tpu.memory_space<vmem>>, vector<16x128xf32>
    tpu.vector_store %arg7[%c0_87, %c128_88], %108 {strides = array<i32>} : memref<16x896xf32, #tpu.memory_space<vmem>>, vector<16x128xf32>,
    %c32_89 = arith.constant 32 : index
    %110 = arith.index_cast %101 : i32 to index
    %111 = vector.load %arg6[%c32_89, %110] : memref<112x512xf32, #tpu.memory_space<vmem>>, vector<16x128xf32>
    %c0_90 = arith.constant 0 : index
    %c256_91 = arith.constant 256 : index
    %112 = vector.load %arg7[%c0_90, %c256_91] : memref<16x896xf32, #tpu.memory_space<vmem>>, vector<16x128xf32>
    tpu.vector_store %arg7[%c0_90, %c256_91], %111 {strides = array<i32>} : memref<16x896xf32, #tpu.memory_space<vmem>>, vector<16x128xf32>,
    %c48_92 = arith.constant 48 : index
    %113 = arith.index_cast %101 : i32 to index
    %114 = vector.load %arg6[%c48_92, %113] : memref<112x512xf32, #tpu.memory_space<vmem>>, vector<16x128xf32>
    %c0_93 = arith.constant 0 : index
    %c384_94 = arith.constant 384 : index
    %115 = vector.load %arg7[%c0_93, %c384_94] : memref<16x896xf32, #tpu.memory_space<vmem>>, vector<16x128xf32>
    tpu.vector_store %arg7[%c0_93, %c384_94], %114 {strides = array<i32>} : memref<16x896xf32, #tpu.memory_space<vmem>>, vector<16x128xf32>,
    %c64_95 = arith.constant 64 : index
    %116 = arith.index_cast %101 : i32 to index
    %117 = vector.load %arg6[%c64_95, %116] : memref<112x512xf32, #tpu.memory_space<vmem>>, vector<16x128xf32>
    %c0_96 = arith.constant 0 : index
    %c512_97 = arith.constant 512 : index
    %118 = vector.load %arg7[%c0_96, %c512_97] : memref<16x896xf32, #tpu.memory_space<vmem>>, vector<16x128xf32>
    tpu.vector_store %arg7[%c0_96, %c512_97], %117 {strides = array<i32>} : memref<16x896xf32, #tpu.memory_space<vmem>>, vector<16x128xf32>,
    %c80_98 = arith.constant 80 : index
    %119 = arith.index_cast %101 : i32 to index
    %120 = vector.load %arg6[%c80_98, %119] : memref<112x512xf32, #tpu.memory_space<vmem>>, vector<16x128xf32>
    %c0_99 = arith.constant 0 : index
    %c640_100 = arith.constant 640 : index
    %121 = vector.load %arg7[%c0_99, %c640_100] : memref<16x896xf32, #tpu.memory_space<vmem>>, vector<16x128xf32>
    tpu.vector_store %arg7[%c0_99, %c640_100], %120 {strides = array<i32>} : memref<16x896xf32, #tpu.memory_space<vmem>>, vector<16x128xf32>,
    %c96_101 = arith.constant 96 : index
    %122 = arith.index_cast %101 : i32 to index
    %123 = vector.load %arg6[%c96_101, %122] : memref<112x512xf32, #tpu.memory_space<vmem>>, vector<16x128xf32>
    %c0_102 = arith.constant 0 : index
    %c768_103 = arith.constant 768 : index
    %124 = vector.load %arg7[%c0_102, %c768_103] : memref<16x896xf32, #tpu.memory_space<vmem>>, vector<16x128xf32>
    tpu.vector_store %arg7[%c0_102, %c768_103], %123 {strides = array<i32>} : memref<16x896xf32, #tpu.memory_space<vmem>>, vector<16x128xf32>,
    %c0_104 = arith.constant 0 : index
    %c0_105 = arith.constant 0 : index
    %125 = vector.load %arg7[%c0_104, %c0_105] : memref<16x896xf32, #tpu.memory_space<vmem>>, vector<16x896xf32>
    %c0_106 = arith.constant 0 : index
    %c0_107 = arith.constant 0 : index
    %126 = vector.load %arg3[%c0_106, %c0_107] : memref<896x128xf32, #tpu.memory_space<vmem>>, vector<896x128xf32>
    %cst_108 = arith.constant dense<0.000000e+00> : vector<16x128xf32>
    %127 = tpu.matmul %125, %126, %cst_108 {dimension_numbers = #tpu.dot_dimension_numbers<[1], [0], [0], [1], [0, 0, 1, 1], [], []>} : vector<16x896xf32>, vector<896x128xf32>, vector<16x128xf32> -> vector<16x128xf32>
    %128 = arith.addf %127, %6 : vector<16x128xf32>
    %c0_109 = arith.constant 0 : index
    %129 = arith.index_cast %103 : i32 to index
    %130 = vector.load %arg5[%c0_109, %129] : memref<16x512xf32, #tpu.memory_space<vmem>>, vector<16x128xf32>
    tpu.vector_store %arg5[%c0_109, %129], %128 {strides = array<i32>} : memref<16x512xf32, #tpu.memory_space<vmem>>, vector<16x128xf32>,
    %c4_i32 = arith.constant 4 : i32
    return
  }
  func.func @transform_0(%arg0: i32) -> (i32, i32) {
    %c0_i32 = arith.constant 0 : i32
    %c0_i32_0 = arith.constant 0 : i32
    return %c0_i32, %arg0 : i32, i32
  }
  func.func @transform_1(%arg0: i32) -> (i32, i32) {
    %c0_i32 = arith.constant 0 : i32
    %c0_i32_0 = arith.constant 0 : i32
    %c0_i32_1 = arith.constant 0 : i32
    return %c0_i32, %c0_i32_0 : i32, i32
  }
  func.func @transform_2(%arg0: i32) -> (i32, i32) {
    %c0_i32 = arith.constant 0 : i32
    %c0_i32_0 = arith.constant 0 : i32
    %c0_i32_1 = arith.constant 0 : i32
    return %c0_i32, %c0_i32_0 : i32, i32
  }
  func.func @transform_3(%arg0: i32) -> (i32, i32) {
    %c0_i32 = arith.constant 0 : i32
    %c0_i32_0 = arith.constant 0 : i32
    %c0_i32_1 = arith.constant 0 : i32
    return %c0_i32, %c0_i32_0 : i32, i32
  }
  func.func @transform_4(%arg0: i32) -> (i32, i32) {
    %c0_i32 = arith.constant 0 : i32
    %c0_i32_0 = arith.constant 0 : i32
    return %c0_i32, %arg0 : i32, i32
  }
}

</mosaic_0001>

<bundles_post_ra>
// kernel: tpu_custom_call.1
= control target key start
LH: loop header
LB: loop body
LE: loop exit
PB: predicated region body
PF: predicated region fallthrough
CT: control target
= control target key end

     0   :  { %9 = vsyncpa [#allocation5], 0  ;;  %s2817_s0 = inlined_call_operand.vmem [shape: f32[16,512], index: 0, kind: input, shape index: {}]   ;;  %s2818_s1 = inlined_call_operand.vmem [shape: f32[112,16], index: 1, kind: input, shape index: {}]   ;;  %s2819_s2 = inlined_call_operand.hbm [shape: f32[896,128], index: 2, kind: input, shape index: {}]   ;;  %s2820_s3 = inlined_call_operand.vmem [shape: f32[1,128], index: 3, kind: input, shape index: {}]   ;;  %s2821_s4 = inlined_call_operand.hbm [shape: f32[16,512], index: 4, kind: output, shape index: {}]  }
   0x1   :  { %10 = vsyncpa [#allocation6], 0  ;;  %s19_s17 = sshll.u32 %s2819_s2, 4  ;;  %s1803_s18 = smov [#allocation4]   ;;  %s20_s17 = int_to_ptr.hbm [resolvable:$true] %s19_s17 }
   0x2   :  { %s21_s19 = sshll.u32 %s1803_s18, 4  ;;  %s1804_s20 = smov 128   ;;  %s22_s19 = int_to_ptr.vmem [resolvable:$true] %s21_s19 }
   0x3   :  { %s1805_s21 = smov 8  }
   0x4   :  { %27 = dma.hbm_to_vmem [thread:$0]  %s20_s17, 14336, %s22_s19, [#allocation5], %s1804_s20, %s1804_s20, %s1805_s21  }
   0x5   :  { %1799 = dma.done.wait [#allocation5], 14336  }
   0x6   :  { %1800 = vsyncadd [#allocation5], 4294952960  ;;  %v52_v0 = vld [vmem:[%s2817_s0 + $0x20] sm:$0xff]  ;;  %vm56_vm0 = vcmask 130048   ;;  %v53_v3 = vld [vmem:[%s2817_s0 + $0x28] sm:$0xff]  ;;  %s1675_s15 = sshll.u32 %s2821_s4, 4  ;;  %s1676_s15 = int_to_ptr.hbm [resolvable:$true] %s1675_s15 }
   0x7   :  { %v48_v1 = vld [vmem:[%s2817_s0] sm:$0xff]  ;;  %113 = vmatpush.msra.mxu0 %v52_v0  ;;  %v49_v4 = vld [vmem:[%s2817_s0 + $0x8] sm:$0xff]  ;;  %172 = vmatpush.msra.mxu1 %v53_v3  ;;  %v54_v6 = vld [vmem:[%s2817_s0 + $0x30] sm:$0xff]  ;;  %s1807_s16 = smov 512   ;;  %s1808_s17 = smov 32  }
   0x8   :  { %v34_v2 = vld [vmem:[%s2818_s1] sm:$0xff]  ;;  %v35_v5 = vld [vmem:[%s2818_s1 + $0x8] sm:$0xff]  ;;  %v50_v7 = vld [vmem:[%s2817_s0 + $0x10] sm:$0xff]  ;;  %231 = vmatpush.msra.mxu2 %v54_v6 }
   0x9   :  { %114 = vmatpush.msra.mxu0 %v48_v1  ;;  %173 = vmatpush.msra.mxu1 %v49_v4  ;;  %v36_v8 = vld [vmem:[%s2818_s1 + $0x10] sm:$0xff]  ;;  %v37_v9 = vld [vmem:[%s2818_s1 + $0x18] sm:$0xff]  ;;  %v38_v12 = vld [vmem:[%s2818_s1 + $0x20] sm:$0xff] }
   0xa   :  { %1688 = vmatmul.msk.f32.vlgmr.msra.gmra.mxu0 %vm56_vm0, %v34_v2  ;;  %1702 = vmatmul.msk.f32.vlgmr.msra.gmra.mxu1 %vm56_vm0, %v34_v2  ;;  %v55_v10 = vld [vmem:[%s2817_s0 + $0x38] sm:$0xff]  ;;  %v39_v13 = vld [vmem:[%s2818_s1 + $0x28] sm:$0xff]  ;;  %v40_v14 = vld [vmem:[%s2818_s1 + $0x30] sm:$0xff] }
   0xb   :  { %232 = vmatpush.msra.mxu2 %v50_v7  ;;  %v51_v11 = vld [vmem:[%s2817_s0 + $0x18] sm:$0xff]  ;;  %290 = vmatpush.msra.mxu3 %v55_v10  ;;  %v1919_v17 = vld [vmem:[%s2818_s1 + $0x40] sm:$0xff]  ;;  %v1923_v18 = vld [vmem:[#allocation4 + $0x70] sm:$0xff] }
   0xc   :  { %1716 = vmatmul.msk.f32.vlgmr.msra.gmra.mxu2 %vm56_vm0, %v34_v2  ;;  %v41_v15 = vld [vmem:[%s2818_s1 + $0x38] sm:$0xff]  ;;  %v1925_v19 = vld [vmem:[#allocation4 + $0x68] sm:$0xff]  ;;  %v1930_v20 = vld [vmem:[#allocation4 + $0x60] sm:$0xff] }
   0xd   :  { %291 = vmatpush.msra.mxu3 %v51_v11  ;;  %v1910_v16 = vld [vmem:[#allocation4 + $0x78] sm:$0xff]  ;;  %v1940_v22 = vld [vmem:[%s2818_s1 + $0x48] sm:$0xff]  ;;  %v1946_v23 = vld [vmem:[#allocation4 + $0x50] sm:$0xff] }
   0xe   :  { %1730 = vmatmul.msk.f32.vlgmr.msra.gmra.mxu3 %vm56_vm0, %v34_v2  ;;  %549 = vmatpush.msrb.mxu0 %v1910_v16  ;;  %v1935_v21 = vld [vmem:[#allocation4 + $0x58] sm:$0xff]  ;;  %v1948_v24 = vld [vmem:[#allocation4 + $0x48] sm:$0xff]  ;;  %v1957_v27 = vld [vmem:[#allocation4 + $0x40] sm:$0xff] }
   0xf   :  { %v1951_v25 = vld [vmem:[#allocation4 + $0xf8] sm:$0xff]  ;;  %v1960_v28 = vld [vmem:[#allocation4 + $0xf0] sm:$0xff]  ;;  %v1971_v31 = vld [vmem:[#allocation4 + $0xe8] sm:$0xff] }
  0x10   :  { %550 = vmatpush.msrb.mxu0 %v1923_v18  ;;  %v1953_v26 = vld [vmem:[#allocation4 + $0x1f8] sm:$0xff]  ;;  %572 = vmatpush.msrb.mxu1 %v1951_v25  ;;  %v1964_v29 = vld [vmem:[#allocation4 + $0x1f0] sm:$0xff]  ;;  %v1980_v33 = vld [vmem:[#allocation4 + $0x1e8] sm:$0xff] }
  0x11   :  { %618 = vmatpush.msrb.mxu3 %v1953_v26  ;;  %v1969_v30 = vld [vmem:[#allocation4 + $0x38] sm:$0xff]  ;;  %v1976_v32 = vld [vmem:[%s2818_s1 + $0x50] sm:$0xff]  ;;  %v1985_v35 = vld [vmem:[#allocation4 + $0xe0] sm:$0xff] }
  0x12   :  { %1689 = vmatmul.msk.f32.gmra.mxu0 %vm56_vm0, %v35_v5  ;;  %1703 = vmatmul.msk.f32.gmra.mxu1 %vm56_vm0, %v35_v5  ;;  %v1982_v34 = vld [vmem:[#allocation4 + $0x30] sm:$0xff]  ;;  %v1989_v36 = vld [vmem:[#allocation4 + $0x1e0] sm:$0xff]  ;;  %v1993_v37 = vld [vmem:[#allocation4 + $0x28] sm:$0xff] }
  0x13   :  { %551 = vmatpush.msrb.mxu0 %v1925_v19  ;;  %573 = vmatpush.msrb.mxu1 %v1960_v28  ;;  %v1996_v38 = vld [vmem:[#allocation4 + $0xd8] sm:$0xff]  ;;  %v2002_v39 = vld [vmem:[#allocation4 + $0x20] sm:$0xff]  ;;  %v2009_v41 = vld [vmem:[#allocation4 + $0xd0] sm:$0xff] }
  0x14   :  { %1717 = vmatmul.msk.f32.gmra.mxu2 %vm56_vm0, %v35_v5  ;;  %619 = vmatpush.msrb.mxu3 %v1964_v29  ;;  %v2005_v40 = vld [vmem:[#allocation4 + $0x1d8] sm:$0xff]  ;;  %v2016_v43 = vld [vmem:[#allocation4 + $0x1d0] sm:$0xff]  ;;  %v2025_v45 = vld [vmem:[#allocation4 + $0xc8] sm:$0xff] }
  0x15   :  { %552 = vmatpush.msrb.mxu0 %v1930_v20  ;;  %574 = vmatpush.msrb.mxu1 %v1971_v31  ;;  %v2014_v42 = vld [vmem:[#allocation4 + $0x18] sm:$0xff]  ;;  %v2027_v46 = vld [vmem:[#allocation4 + $0x10] sm:$0xff]  ;;  %v2030_v47 = vld [vmem:[#allocation4 + $0x1c8] sm:$0xff] }
  0x16   :  { %1731 = vmatmul.msk.f32.gmra.mxu3 %vm56_vm0, %v35_v5  ;;  %v2021_v44 = vld [vmem:[%s2818_s1 + $0x58] sm:$0xff]  ;;  %v2036_v48 = vld [vmem:[#allocation4 + $0x8] sm:$0xff]  ;;  %v2044_v49 = vld [vmem:[#allocation4] sm:$0xff] }
  0x17   :  { %553 = vmatpush.msrb.mxu0 %v1935_v21  ;;  %620 = vmatpush.msrb.mxu3 %v1980_v33  ;;  %v2046_v50 = vld [vmem:[#allocation4 + $0xc0] sm:$0xff]  ;;  %v2062_v53 = vld [vmem:[#allocation4 + $0xb8] sm:$0xff]  ;;  %v2072_v57 = vld [vmem:[#allocation4 + $0xb0] sm:$0xff] }
  0x18   :  { %575 = vmatpush.msrb.mxu1 %v1985_v35  ;;  %v2055_v51 = vld [vmem:[%s2818_s1 + $0x60] sm:$0xff]  ;;  %v2064_v54 = vld [vmem:[#allocation4 + $0x178] sm:$0xff]  ;;  %2877 = vst [vmem:[#allocation13_spill] sm:$0xff] %v2072_v57  ;;  %v2074_v58 = vld [vmem:[#allocation4 + $0x170] sm:$0xff] }
  0x19   :  { %554 = vmatpush.msrb.mxu0 %v1946_v23  ;;  %621 = vmatpush.msrb.mxu3 %v1989_v36  ;;  %v2059_v52 = vld [vmem:[#allocation4 + $0x1c0] sm:$0xff]  ;;  %2875 = vst [vmem:[#allocation11_spill] sm:$0xff] %v2064_v54  ;;  %v2066_v55 = vld [vmem:[#allocation4 + $0x1b8] sm:$0xff]  ;;  %v2079_v59 = vld [vmem:[#allocation4 + $0x1b0] sm:$0xff] }
  0x1a   :  { %1690 = vmatmul.msk.f32.gmra.mxu0 %vm56_vm0, %v36_v8  ;;  %1704 = vmatmul.msk.f32.gmra.mxu1 %vm56_vm0, %v36_v8  ;;  %2874 = vst [vmem:[#allocation10_spill] sm:$0xff] %v2059_v52  ;;  %v2070_v56 = vld [vmem:[#allocation4 + $0x278] sm:$0xff]  ;;  %v2081_v60 = vld [vmem:[#allocation4 + $0x270] sm:$0xff]  ;;  %v2085_v61 = vld [vmem:[#allocation4 + $0xa8] sm:$0xff] }
  0x1b   :  { %555 = vmatpush.msrb.mxu0 %v1948_v24  ;;  %576 = vmatpush.msrb.mxu1 %v1996_v38  ;;  %2876 = vst [vmem:[#allocation12_spill] sm:$0xff] %v2066_v55  ;;  %v2087_v62 = vld [vmem:[#allocation4 + $0x168] sm:$0xff]  ;;  %v2100_v1 = vld [vmem:[#allocation4 + $0xa0] sm:$0xff]  ;;  %v2117_v6 = vld [vmem:[#allocation4 + $0x98] sm:$0xff] }
  0x1c   :  { %1718 = vmatmul.msk.f32.gmra.mxu2 %vm56_vm0, %v36_v8  ;;  %622 = vmatpush.msrb.mxu3 %v2005_v40  ;;  %2878 = vst [vmem:[#allocation14_spill] sm:$0xff] %v2074_v58  ;;  %v2092_v63 = vld [vmem:[#allocation4 + $0x1a8] sm:$0xff]  ;;  %v2102_v2 = vld [vmem:[#allocation4 + $0x160] sm:$0xff]  ;;  %v2123_v7 = vld [vmem:[#allocation4 + $0x158] sm:$0xff] }
  0x1d   :  { %556 = vmatpush.msrb.mxu0 %v1957_v27  ;;  %577 = vmatpush.msrb.mxu1 %v2009_v41  ;;  %2879 = vst [vmem:[#allocation15_spill] sm:$0xff] %v2079_v59  ;;  %v2094_v0 = vld [vmem:[#allocation4 + $0x268] sm:$0xff]  ;;  %v2111_v4 = vld [vmem:[#allocation4 + $0x1a0] sm:$0xff]  ;;  %v2134_v10 = vld [vmem:[#allocation4 + $0x90] sm:$0xff] }
  0x1e   :  { %1732 = vmatmul.msk.f32.gmra.mxu3 %vm56_vm0, %v36_v8  ;;  %595 = vmatpush.msrb.mxu2 %v2064_v54  ;;  %2880 = vst [vmem:[#allocation16_spill] sm:$0xff] %v2087_v62  ;;  %v2107_v3 = vld [vmem:[%s2818_s1 + $0x68] sm:$0xff]  ;;  %v2115_v5 = vld [vmem:[#allocation4 + $0x260] sm:$0xff]  ;;  %v2128_v8 = vld [vmem:[#allocation4 + $0x198] sm:$0xff] }
  0x1f   :  { %557 = vmatpush.msrb.mxu0 %v1969_v30  ;;  %623 = vmatpush.msrb.mxu3 %v2016_v43  ;;  %2881 = vst [vmem:[#allocation17_spill] sm:$0xff] %v2092_v63  ;;  %v2136_v11 = vld [vmem:[#allocation4 + $0x150] sm:$0xff] }
  0x20   :  { %578 = vmatpush.msrb.mxu1 %v2025_v45  ;;  %596 = vmatpush.msrb.mxu2 %v2074_v58  ;;  %2882 = vst [vmem:[#allocation18_spill] sm:$0xff] %v2102_v2 }
  0x21   :  { %558 = vmatpush.msrb.mxu0 %v1982_v34  ;;  %624 = vmatpush.msrb.mxu3 %v2030_v47  ;;  %2883 = vst [vmem:[#allocation19_spill] sm:$0xff] %v2111_v4 }
  0x22   :  { %1691 = vmatmul.msk.f32.gmra.mxu0 %vm56_vm0, %v37_v9  ;;  %1705 = vmatmul.msk.f32.gmra.mxu1 %vm56_vm0, %v37_v9  ;;  %2884 = vst [vmem:[#allocation20_spill] sm:$0xff] %v2117_v6 }
  0x23   :  { %559 = vmatpush.msrb.mxu0 %v1993_v37  ;;  %579 = vmatpush.msrb.mxu1 %v2046_v50  ;;  %2885 = vst [vmem:[#allocation21_spill] sm:$0xff] %v2128_v8 }
  0x24   :  { %1719 = vmatmul.msk.f32.gmra.mxu2 %vm56_vm0, %v37_v9  ;;  %625 = vmatpush.msrb.mxu3 %v2059_v52  ;;  %2886 = vst [vmem:[#allocation22_spill] sm:$0xff] %v2136_v11  ;;  %v2191_v52 = vld [vmem:[#allocation4 + $0x2f0] sm:$0xff] }
  0x25   :  { %560 = vmatpush.msrb.mxu0 %v2002_v39  ;;  %580 = vmatpush.msrb.mxu1 %v2062_v53  ;;  %2897 = vst [vmem:[#allocation33_spill] sm:$0xff] %v2191_v52 }
  0x26   :  { %1733 = vmatmul.msk.f32.gmra.mxu3 %vm56_vm0, %v37_v9  ;;  %597 = vmatpush.msrb.mxu2 %v2087_v62  ;;  %v2130_v9 = vld [vmem:[#allocation4 + $0x258] sm:$0xff] }
  0x27   :  { %561 = vmatpush.msrb.mxu0 %v2014_v42  ;;  %626 = vmatpush.msrb.mxu3 %v2066_v55  ;;  %v2179_v55 = vld [vmem:[#allocation4 + $0x238] sm:$0xff] }
  0x28   :  { %581 = vmatpush.msrb.mxu1 %v2072_v57  ;;  %598 = vmatpush.msrb.mxu2 %v2102_v2  ;;  %2894 = vst [vmem:[#allocation30_spill] sm:$0xff] %v2179_v55 }
  0x29   :  { %562 = vmatpush.msrb.mxu0 %v2027_v46  ;;  %627 = vmatpush.msrb.mxu3 %v2079_v59  ;;  %v2169_v59 = vld [vmem:[#allocation4 + $0x240] sm:$0xff] }
  0x2a   :  { %1692 = vmatmul.msk.f32.gmra.mxu0 %vm56_vm0, %v38_v12  ;;  %1706 = vmatmul.msk.f32.gmra.mxu1 %vm56_vm0, %v38_v12  ;;  %2893 = vst [vmem:[#allocation29_spill] sm:$0xff] %v2169_v59 }
  0x2b   :  { %563 = vmatpush.msrb.mxu0 %v2036_v48  ;;  %582 = vmatpush.msrb.mxu1 %v2085_v61 }
  0x2c   :  { %1720 = vmatmul.msk.f32.gmra.mxu2 %vm56_vm0, %v38_v12  ;;  %628 = vmatpush.msrb.mxu3 %v2092_v63  ;;  %v2167_v63 = vld [vmem:[#allocation4 + $0x180] sm:$0xff] }
  0x2d   :  { %564 = vmatpush.msrb.mxu0 %v2044_v49  ;;  %583 = vmatpush.msrb.mxu1 %v2100_v1  ;;  %2892 = vst [vmem:[#allocation28_spill] sm:$0xff] %v2167_v63 }
  0x2e   :  { %1734 = vmatmul.msk.f32.gmra.mxu3 %vm56_vm0, %v38_v12  ;;  %599 = vmatpush.msrb.mxu2 %v2123_v7  ;;  %v2141_v12 = vld [vmem:[#allocation4 + $0x190] sm:$0xff] }
  0x2f   :  { %641 = vmatpush.msra.mxu0 %v2070_v56  ;;  %629 = vmatpush.msrb.mxu3 %v2111_v4  ;;  %2887 = vst [vmem:[#allocation23_spill] sm:$0xff] %v2141_v12  ;;  %v2159_v4 = vld [vmem:[#allocation4 + $0x80] sm:$0xff] }
  0x30   :  { %584 = vmatpush.msrb.mxu1 %v2117_v6  ;;  %600 = vmatpush.msrb.mxu2 %v2136_v11  ;;  %2891 = vst [vmem:[#allocation27_spill] sm:$0xff] %v2159_v4 }
  0x31   :  { %642 = vmatpush.msra.mxu0 %v2081_v60  ;;  %630 = vmatpush.msrb.mxu3 %v2128_v8  ;;  %v2161_v8 = vld [vmem:[#allocation4 + $0x140] sm:$0xff] }
  0x32   :  { %1693 = vmatmul.msk.f32.gmra.mxu0 %vm56_vm0, %v39_v13  ;;  %1707 = vmatmul.msk.f32.gmra.mxu1 %vm56_vm0, %v39_v13 }
  0x33   :  { %643 = vmatpush.msra.mxu0 %v2094_v0  ;;  %585 = vmatpush.msrb.mxu1 %v2134_v10 }
  0x34   :  { %1721 = vmatmul.msk.f32.gmra.mxu2 %vm56_vm0, %v39_v13  ;;  %631 = vmatpush.msrb.mxu3 %v2141_v12  ;;  %v2173_v12 = vld [vmem:[#allocation4 + $0x138] sm:$0xff] }
  0x35   :  { %644 = vmatpush.msra.mxu0 %v2115_v5 }
  0x36   :  { %1735 = vmatmul.msk.f32.gmra.mxu3 %vm56_vm0, %v39_v13  ;;  %v2143_v13 = vld [vmem:[#allocation4 + $0x250] sm:$0xff] }
  0x37   :  { %2888 = vst [vmem:[#allocation24_spill] sm:$0xff] %v2143_v13  ;;  %645 = vmatpush.msra.mxu0 %v2130_v9 }
  0x39   :  { %646 = vmatpush.msra.mxu0 %v2143_v13  ;;  %v2189_v13 = vld [vmem:[#allocation4 + $0x230] sm:$0xff] }
  0x3a   :  { %1694 = vmatmul.msk.f32.gmra.mxu0 %vm56_vm0, %v40_v14  ;;  %1708 = vmatmul.msk.f32.gmra.mxu1 %vm56_vm0, %v40_v14  ;;  %2896 = vst [vmem:[#allocation32_spill] sm:$0xff] %v2189_v13 }
  0x3c   :  { %1722 = vmatmul.msk.f32.gmra.mxu2 %vm56_vm0, %v40_v14 }
  0x3e   :  { %1736 = vmatmul.msk.f32.gmra.mxu3 %vm56_vm0, %v40_v14  ;;  %v2147_v14 = vld [vmem:[#allocation4 + $0x88] sm:$0xff] }
  0x3f   :  { %586 = vmatpush.msrb.mxu1 %v2147_v14 }
  0x41   :  { %587 = vmatpush.msrb.mxu1 %v2159_v4 }
  0x42   :  { %1695 = vmatmul.msk.f32.gmra.mxu0 %vm56_vm0, %v41_v15  ;;  %1709 = vmatmul.msk.f32.gmra.mxu1 %vm56_vm0, %v41_v15 }
  0x44   :  { %1723 = vmatmul.msk.f32.gmra.mxu2 %vm56_vm0, %v41_v15 }
  0x46   :  { %1737 = vmatmul.msk.f32.gmra.mxu3 %vm56_vm0, %v41_v15  ;;  %v2149_v15 = vld [vmem:[#allocation4 + $0x148] sm:$0xff] }
  0x47   :  { %601 = vmatpush.msrb.mxu2 %v2149_v15 }
  0x49   :  { %602 = vmatpush.msrb.mxu2 %v2161_v8 }
  0x4a   :  { %1696 = vmatmul.msk.f32.gmra.mxu0 %vm56_vm0, %v1919_v17  ;;  %1710 = vmatmul.msk.f32.gmra.mxu1 %vm56_vm0, %v1919_v17 }
  0x4b   :  { %603 = vmatpush.msrb.mxu2 %v2173_v12 }
  0x4c   :  { %1724 = vmatmul.msk.f32.gmra.mxu2 %vm56_vm0, %v1919_v17 }
  0x4e   :  { %1738 = vmatmul.msk.f32.gmra.mxu3 %vm56_vm0, %v1919_v17  ;;  %v2153_v17 = vld [vmem:[#allocation4 + $0x188] sm:$0xff] }
  0x4f   :  { %2889 = vst [vmem:[#allocation25_spill] sm:$0xff] %v2153_v17  ;;  %632 = vmatpush.msrb.mxu3 %v2153_v17  ;;  %v2181_v17 = vld [vmem:[#allocation4 + $0x2f8] sm:$0xff] }
  0x50   :  { %2895 = vst [vmem:[#allocation31_spill] sm:$0xff] %v2181_v17  ;;  %664 = vmatpush.msra.mxu1 %v2181_v17  ;;  %v2211_v17 = vld [vmem:[#allocation4 + $0x220] sm:$0xff] }
  0x51   :  { %633 = vmatpush.msrb.mxu3 %v2167_v63  ;;  %v2199_v63 = vld [vmem:[#allocation4 + $0x228] sm:$0xff]  ;;  %2900 = vst [vmem:[#allocation36_spill] sm:$0xff] %v2211_v17 }
  0x52   :  { %1697 = vmatmul.msk.f32.gmra.mxu0 %vm56_vm0, %v1940_v22  ;;  %1711 = vmatmul.msk.f32.gmra.mxu1 %vm56_vm0, %v1940_v22  ;;  %2898 = vst [vmem:[#allocation34_spill] sm:$0xff] %v2199_v63 }
  0x53   :  { %867 = vmatpush.msra.mxu3 %v1910_v16  ;;  %665 = vmatpush.msra.mxu1 %v2191_v52  ;;  %v2205_v16 = vld [vmem:[#allocation4 + $0x120] sm:$0xff] }
  0x54   :  { %1725 = vmatmul.msk.f32.gmra.mxu2 %vm56_vm0, %v1940_v22 }
  0x55   :  { %868 = vmatpush.msra.mxu3 %v1923_v18  ;;  %v2213_v18 = vld [vmem:[#allocation4 + $0x2e0] sm:$0xff] }
  0x56   :  { %1739 = vmatmul.msk.f32.gmra.mxu3 %vm56_vm0, %v1940_v22  ;;  %v2155_v22 = vld [vmem:[#allocation4 + $0x248] sm:$0xff]  ;;  %2901 = vst [vmem:[#allocation37_spill] sm:$0xff] %v2213_v18 }
  0x57   :  { %2890 = vst [vmem:[#allocation26_spill] sm:$0xff] %v2155_v22  ;;  %647 = vmatpush.msra.mxu0 %v2155_v22  ;;  %v2185_v22 = vld [vmem:[#allocation4 + $0x130] sm:$0xff]  ;;  %869 = vmatpush.msra.mxu3 %v1925_v19  ;;  %v2223_v19 = vld [vmem:[#allocation4 + $0x218] sm:$0xff] }
  0x58   :  { %604 = vmatpush.msrb.mxu2 %v2185_v22  ;;  %2902 = vst [vmem:[#allocation38_spill] sm:$0xff] %v2223_v19 }
  0x59   :  { %648 = vmatpush.msra.mxu0 %v2169_v59  ;;  %v2201_v59 = vld [vmem:[#allocation4 + $0x2e8] sm:$0xff]  ;;  %870 = vmatpush.msra.mxu3 %v1930_v20  ;;  %v2233_v20 = vld [vmem:[#allocation4 + $0x210] sm:$0xff] }
  0x5a   :  { %1698 = vmatmul.msk.f32.gmra.mxu0 %vm56_vm0, %v1976_v32  ;;  %1712 = vmatmul.msk.f32.gmra.mxu1 %vm56_vm0, %v1976_v32  ;;  %2899 = vst [vmem:[#allocation35_spill] sm:$0xff] %v2201_v59 }
  0x5b   :  { %649 = vmatpush.msra.mxu0 %v2179_v55  ;;  %666 = vmatpush.msra.mxu1 %v2201_v59  ;;  %v2229_v59 = vld [vmem:[#allocation4 + $0x110] sm:$0xff]  ;;  %v2239_v55 = vld [vmem:[#allocation4 + $0x108] sm:$0xff] }
  0x5c   :  { %1726 = vmatmul.msk.f32.gmra.mxu2 %vm56_vm0, %v1976_v32  ;;  %871 = vmatpush.msra.mxu3 %v1935_v21  ;;  %v2246_v21 = vld [vmem:[#allocation4 + $0x2c8] sm:$0xff] }
  0x5d   :  { %650 = vmatpush.msra.mxu0 %v2189_v13  ;;  %v2217_v13 = vld [vmem:[#allocation4 + $0x118] sm:$0xff]  ;;  %667 = vmatpush.msra.mxu1 %v2213_v18  ;;  %v2242_v18 = vld [vmem:[#allocation4 + $0x208] sm:$0xff]  ;;  %2905 = vst [vmem:[#allocation41_spill] sm:$0xff] %v2246_v21 }
  0x5e   :  { %1740 = vmatmul.msk.f32.gmra.mxu3 %vm56_vm0, %v1976_v32  ;;  %v2195_v32 = vld [vmem:[#allocation4 + $0x128] sm:$0xff]  ;;  %2904 = vst [vmem:[#allocation40_spill] sm:$0xff] %v2242_v18 }
  0x5f   :  { %605 = vmatpush.msrb.mxu2 %v2195_v32  ;;  %651 = vmatpush.msra.mxu0 %v2199_v63  ;;  %v2225_v63 = vld [vmem:[#allocation4 + $0x2d8] sm:$0xff] }
  0x60   :  { %2903 = vst [vmem:[#allocation39_spill] sm:$0xff] %v2225_v63  ;;  %668 = vmatpush.msra.mxu1 %v2225_v63  ;;  %872 = vmatpush.msra.mxu3 %v1946_v23  ;;  %v2254_v63 = vld [vmem:[#allocation4 + $0x200] sm:$0xff]  ;;  %v2264_v23 = vld [vmem:[#allocation4 + $0x2b8] sm:$0xff] }
  0x61   :  { %606 = vmatpush.msrb.mxu2 %v2205_v16  ;;  %652 = vmatpush.msra.mxu0 %v2211_v17  ;;  %v2248_v17 = vld [vmem:[#allocation4 + $0x100] sm:$0xff]  ;;  %2906 = vst [vmem:[#allocation42_spill] sm:$0xff] %v2264_v23 }
  0x62   :  { %1699 = vmatmul.msk.f32.gmra.mxu0 %vm56_vm0, %v2021_v44  ;;  %1713 = vmatmul.msk.f32.gmra.mxu1 %vm56_vm0, %v2021_v44 }
  0x63   :  { %607 = vmatpush.msrb.mxu2 %v2217_v13  ;;  %653 = vmatpush.msra.mxu0 %v2223_v19 }
  0x64   :  { %1727 = vmatmul.msk.f32.gmra.mxu2 %vm56_vm0, %v2021_v44  ;;  %873 = vmatpush.msra.mxu3 %v1948_v24  ;;  %v2269_v24 = vld [vmem:[#allocation4 + $0x378] sm:$0xff] }
  0x65   :  { %608 = vmatpush.msrb.mxu2 %v2229_v59  ;;  %654 = vmatpush.msra.mxu0 %v2233_v20 }
  0x66   :  { %1741 = vmatmul.msk.f32.gmra.mxu3 %vm56_vm0, %v2021_v44  ;;  %v2237_v44 = vld [vmem:[#allocation4 + $0x2d0] sm:$0xff] }
  0x67   :  { %669 = vmatpush.msra.mxu1 %v2237_v44  ;;  %609 = vmatpush.msrb.mxu2 %v2239_v55 }
  0x68   :  { %655 = vmatpush.msra.mxu0 %v2242_v18  ;;  %874 = vmatpush.msra.mxu3 %v1957_v27  ;;  %v2276_v27 = vld [vmem:[#allocation4 + $0x370] sm:$0xff] }
  0x69   :  { %670 = vmatpush.msra.mxu1 %v2246_v21  ;;  %610 = vmatpush.msrb.mxu2 %v2248_v17  ;;  %v2273_v21 = vld [vmem:[#allocation4 + $0x2b0] sm:$0xff] }
  0x6a   :  { %1700 = vmatmul.msk.f32.gmra.mxu0 %vm56_vm0, %v2055_v51  ;;  %1714 = vmatmul.msk.f32.gmra.mxu1 %vm56_vm0, %v2055_v51  ;;  %2907 = vst [vmem:[#allocation43_spill] sm:$0xff] %v2273_v21 }
  0x6b   :  { %656 = vmatpush.msra.mxu0 %v2254_v63  ;;  %875 = vmatpush.msra.mxu3 %v1969_v30  ;;  %v2284_v30 = vld [vmem:[#allocation4 + $0x368] sm:$0xff] }
  0x6c   :  { %1728 = vmatmul.msk.f32.gmra.mxu2 %vm56_vm0, %v2055_v51  ;;  %2909 = vst [vmem:[#allocation45_spill] sm:$0xff] %v2284_v30 }
  0x6d   :  { %687 = vmatpush.msra.mxu2 %v2269_v24  ;;  %876 = vmatpush.msra.mxu3 %v1982_v34  ;;  %v2294_v34 = vld [vmem:[#allocation4 + $0x360] sm:$0xff] }
  0x6e   :  { %1742 = vmatmul.msk.f32.gmra.mxu3 %vm56_vm0, %v2055_v51  ;;  %v2280_v51 = vld [vmem:[#allocation4 + $0x2a8] sm:$0xff] }
  0x6f   :  { %2908 = vst [vmem:[#allocation44_spill] sm:$0xff] %v2280_v51  ;;  %688 = vmatpush.msra.mxu2 %v2276_v27  ;;  %877 = vmatpush.msra.mxu3 %v1993_v37  ;;  %v2301_v37 = vld [vmem:[#allocation4 + $0x298] sm:$0xff] }
  0x71   :  { %689 = vmatpush.msra.mxu2 %v2284_v30  ;;  %878 = vmatpush.msra.mxu3 %v2002_v39  ;;  %v2308_v30 = vld [vmem:[#allocation4 + $0x290] sm:$0xff] }
  0x72   :  { %1701 = vmatmul.msk.f32.gmra.mxu0 %vm56_vm0, %v2107_v3  ;;  %1715 = vmatmul.msk.f32.gmra.mxu1 %vm56_vm0, %v2107_v3  ;;  %2911 = vst [vmem:[#allocation47_spill] sm:$0xff] %v2308_v30  ;;  %v2312_v39 = vld [vmem:[#allocation4 + $0x350] sm:$0xff] }
  0x73   :  { %690 = vmatpush.msra.mxu2 %v2294_v34  ;;  %879 = vmatpush.msra.mxu3 %v2014_v42  ;;  %v2324_v42 = vld [vmem:[#allocation4 + $0x280] sm:$0xff] }
  0x74   :  { %1729 = vmatmul.msk.f32.gmra.mxu2 %vm56_vm0, %v2107_v3 }
  0x75   :  { %880 = vmatpush.msra.mxu3 %v2027_v46 }
  0x76   :  { %1743 = vmatmul.msk.f32.gmra.mxu3 %vm56_vm0, %v2107_v3  ;;  %v2316_v3 = vld [vmem:[#allocation4 + $0x288] sm:$0xff] }
  0x77   :  { %2912 = vst [vmem:[#allocation48_spill] sm:$0xff] %v2316_v3  ;;  %881 = vmatpush.msra.mxu3 %v2036_v48  ;;  %v2336_v48 = vld [vmem:[#allocation4 + $0x338] sm:$0xff] }
  0x79   :  { %882 = vmatpush.msra.mxu3 %v2044_v49  ;;  %v2346_v49 = vld [vmem:[#allocation4 + $0x328] sm:$0xff] }
  0x87   :  { %v116_v52 = vpop.f32.mrf.mxu0  ;;  %v2250_v19 = vpop.f32.mrf.mxu1 }
  0x88   :  { %565 = vmatmul.f32.vlgmr.msrb.gmra.mxu0 %v116_v52  ;;  %v2258_v52 = vld [vmem:[#allocation4 + $0x2c0] sm:$0xff] }
  0x89   :  { %671 = vmatpush.msra.mxu1 %v2258_v52  ;;  %890 = vmatpush.msrb.mxu0 %v1951_v25 }
  0x8b   :  { %672 = vmatpush.msra.mxu1 %v2264_v23  ;;  %891 = vmatpush.msrb.mxu0 %v1960_v28  ;;  %v2292_v23 = vld [vmem:[#allocation4 + $0x2a0] sm:$0xff] }
  0x8d   :  { %673 = vmatpush.msra.mxu1 %v2273_v21  ;;  %892 = vmatpush.msrb.mxu0 %v1971_v31 }
  0x8f   :  { %v119_v18 = vpop.f32.mrf.mxu0  ;;  %674 = vmatpush.msra.mxu1 %v2280_v51  ;;  %893 = vmatpush.msrb.mxu0 %v1985_v35  ;;  %v2305_v51 = vld [vmem:[#allocation4 + $0x358] sm:$0xff] }
  0x90   :  { %568 = vmatmul.f32.gmra.mxu0 %v119_v18  ;;  %v2288_v18 = vpop.f32.mrf.mxu1  ;;  %2910 = vst [vmem:[#allocation46_spill] sm:$0xff] %v2305_v51  ;;  %691 = vmatpush.msra.mxu2 %v2305_v51  ;;  %v2328_v51 = vld [vmem:[#allocation4 + $0x340] sm:$0xff] }
  0x91   :  { %675 = vmatpush.msra.mxu1 %v2292_v23  ;;  %894 = vmatpush.msrb.mxu0 %v1996_v38 }
  0x92   :  { %692 = vmatpush.msra.mxu2 %v2312_v39 }
  0x93   :  { %676 = vmatpush.msra.mxu1 %v2301_v37  ;;  %895 = vmatpush.msrb.mxu0 %v2009_v41 }
  0x95   :  { %677 = vmatpush.msra.mxu1 %v2308_v30  ;;  %896 = vmatpush.msrb.mxu0 %v2025_v45 }
  0x97   :  { %v122_v21 = vpop.f32.mrf.mxu0  ;;  %678 = vmatpush.msra.mxu1 %v2316_v3  ;;  %897 = vmatpush.msrb.mxu0 %v2046_v50  ;;  %v2341_v3 = vld [vmem:[#allocation4 + $0x330] sm:$0xff] }
  0x98   :  { %588 = vmatmul.f32.vlgmr.msrb.gmra.mxu1 %v122_v21  ;;  %v2320_v21 = vld [vmem:[#allocation4 + $0x348] sm:$0xff]  ;;  %v2330_v46 = vpop.f32.mrf.mxu1 }
  0x99   :  { %693 = vmatpush.msra.mxu2 %v2320_v21  ;;  %679 = vmatpush.msra.mxu1 %v2324_v42 }
  0x9a   :  { %898 = vmatpush.msrb.mxu0 %v2062_v53 }
  0x9b   :  { %694 = vmatpush.msra.mxu2 %v2328_v51  ;;  %913 = vmatpush.msrb.mxu1 %v2064_v54 }
  0x9c   :  { %899 = vmatpush.msrb.mxu0 %v2072_v57 }
  0x9d   :  { %695 = vmatpush.msra.mxu2 %v2336_v48  ;;  %914 = vmatpush.msrb.mxu1 %v2074_v58  ;;  %v2358_v58 = vld [vmem:[#allocation4 + $0x318] sm:$0xff] }
  0x9e   :  { %900 = vmatpush.msrb.mxu0 %v2085_v61 }
  0x9f   :  { %v125_v30 = vpop.f32.mrf.mxu0  ;;  %696 = vmatpush.msra.mxu2 %v2341_v3  ;;  %915 = vmatpush.msrb.mxu1 %v2087_v62  ;;  %v2363_v62 = vld [vmem:[#allocation4 + $0x310] sm:$0xff] }
  0xa0   :  { %591 = vmatmul.f32.gmra.mxu1 %v125_v30  ;;  %v2352_v30 = vld [vmem:[#allocation4 + $0x320] sm:$0xff]  ;;  %901 = vmatpush.msrb.mxu0 %v2100_v1  ;;  %v2356_v57 = vpop.f32.mrf.mxu1 }
  0xa1   :  { %697 = vmatpush.msra.mxu2 %v2346_v49  ;;  %916 = vmatpush.msrb.mxu1 %v2102_v2  ;;  %v2368_v2 = vld [vmem:[#allocation4 + $0x308] sm:$0xff] }
  0xa2   :  { %902 = vmatpush.msrb.mxu0 %v2117_v6 }
  0xa3   :  { %698 = vmatpush.msra.mxu2 %v2352_v30  ;;  %917 = vmatpush.msrb.mxu1 %v2123_v7 }
  0xa4   :  { %903 = vmatpush.msrb.mxu0 %v2134_v10 }
  0xa5   :  { %699 = vmatpush.msra.mxu2 %v2358_v58  ;;  %918 = vmatpush.msrb.mxu1 %v2136_v11 }
  0xa6   :  { %904 = vmatpush.msrb.mxu0 %v2147_v14 }
  0xa7   :  { %v128_v54 = vpop.f32.mrf.mxu0  ;;  %700 = vmatpush.msra.mxu2 %v2363_v62  ;;  %919 = vmatpush.msrb.mxu1 %v2149_v15 }
  0xa8   :  { %611 = vmatmul.f32.vlgmr.msrb.gmra.mxu2 %v128_v54  ;;  %v2373_v54 = vld [vmem:[#allocation4 + $0x300] sm:$0xff]  ;;  %905 = vmatpush.msrb.mxu0 %v2159_v4  ;;  %v2379_v11 = vpop.f32.mrf.mxu1 }
  0xa9   :  { %701 = vmatpush.msra.mxu2 %v2368_v2  ;;  %920 = vmatpush.msrb.mxu1 %v2161_v8 }
  0xab   :  { %702 = vmatpush.msra.mxu2 %v2373_v54  ;;  %921 = vmatpush.msrb.mxu1 %v2173_v12 }
  0xad   :  { %936 = vmatpush.msrb.mxu2 %v1953_v26  ;;  %922 = vmatpush.msrb.mxu1 %v2185_v22 }
  0xaf   :  { %v131_v6 = vpop.f32.mrf.mxu0  ;;  %937 = vmatpush.msrb.mxu2 %v1964_v29  ;;  %923 = vmatpush.msrb.mxu1 %v2195_v32 }
  0xb0   :  { %614 = vmatmul.f32.gmra.mxu2 %v131_v6  ;;  %v2393_v26 = vpop.f32.mrf.mxu1  ;;  %v2921_v6 = vld [vmem:[#allocation30_spill] sm:$0xff] }
  0xb1   :  { %938 = vmatpush.msrb.mxu2 %v1980_v33  ;;  %924 = vmatpush.msrb.mxu1 %v2205_v16  ;;  %v2913_v33 = vld [vmem:[#allocation10_spill] sm:$0xff] }
  0xb3   :  { %939 = vmatpush.msrb.mxu2 %v1989_v36  ;;  %925 = vmatpush.msrb.mxu1 %v2217_v13  ;;  %v2914_v36 = vld [vmem:[#allocation24_spill] sm:$0xff] }
  0xb5   :  { %940 = vmatpush.msrb.mxu2 %v2005_v40  ;;  %926 = vmatpush.msrb.mxu1 %v2229_v59  ;;  %v2915_v40 = vld [vmem:[#allocation12_spill] sm:$0xff] }
  0xb7   :  { %v134_v4 = vpop.f32.mrf.mxu0  ;;  %941 = vmatpush.msrb.mxu2 %v2016_v43  ;;  %927 = vmatpush.msrb.mxu1 %v2239_v55  ;;  %v2917_v43 = vld [vmem:[#allocation26_spill] sm:$0xff] }
  0xb8   :  { %634 = vmatmul.f32.vlgmr.msrb.gmra.mxu3 %v134_v4 }
  0xb9   :  { %959 = vmatpush.msrb.mxu3 %v2070_v56  ;;  %942 = vmatpush.msrb.mxu2 %v2030_v47  ;;  %v2406_v56 = vpop.f32.mrf.mxu2  ;;  %v2919_v47 = vld [vmem:[#allocation29_spill] sm:$0xff] }
  0xba   :  { %928 = vmatpush.msrb.mxu1 %v2248_v17  ;;  %2916 = vst [vmem:[#allocation10_spill] sm:$0xff] %v2406_v56  ;;  %v2935_v56 = vld [vmem:[#allocation25_spill] sm:$0xff] }
  0xbb   :  { %960 = vmatpush.msrb.mxu3 %v2081_v60  ;;  %943 = vmatpush.msrb.mxu2 %v2913_v33  ;;  %v2918_v60 = vld [vmem:[#allocation15_spill] sm:$0xff]  ;;  %v2924_v33 = vld [vmem:[#allocation32_spill] sm:$0xff] }
  0xbd   :  { %961 = vmatpush.msrb.mxu3 %v2094_v0  ;;  %944 = vmatpush.msrb.mxu2 %v2915_v40  ;;  %v2410_v0 = vpop.f32.mrf.mxu1  ;;  %v2926_v40 = vld [vmem:[#allocation21_spill] sm:$0xff] }
  0xbf   :  { %962 = vmatpush.msrb.mxu3 %v2115_v5  ;;  %v137_v29 = vpop.f32.mrf.mxu0  ;;  %945 = vmatpush.msrb.mxu2 %v2918_v60  ;;  %v2920_v5 = vld [vmem:[#allocation17_spill] sm:$0xff]  ;;  %v2928_v60 = vld [vmem:[#allocation35_spill] sm:$0xff] }
  0xc0   :  { %637 = vmatmul.f32.gmra.mxu3 %v137_v29  ;;  %v2923_v29 = vld [vmem:[#allocation19_spill] sm:$0xff] }
  0xc1   :  { %963 = vmatpush.msrb.mxu3 %v2130_v9  ;;  %946 = vmatpush.msrb.mxu2 %v2920_v5  ;;  %v2922_v9 = vld [vmem:[#allocation31_spill] sm:$0xff]  ;;  %v2931_v5 = vld [vmem:[#allocation37_spill] sm:$0xff] }
  0xc3   :  { %964 = vmatpush.msrb.mxu3 %v2914_v36  ;;  %947 = vmatpush.msrb.mxu2 %v2923_v29  ;;  %v2925_v36 = vld [vmem:[#allocation33_spill] sm:$0xff]  ;;  %v2428_v29 = vpop.f32.mrf.mxu3 }
  0xc4   :  { %2932 = vst [vmem:[#allocation24_spill] sm:$0xff] %v2428_v29  ;;  %v2938_v29 = vld [vmem:[#allocation41_spill] sm:$0xff] }
  0xc5   :  { %965 = vmatpush.msrb.mxu3 %v2917_v43  ;;  %948 = vmatpush.msrb.mxu2 %v2926_v40  ;;  %v2927_v43 = vld [vmem:[#allocation34_spill] sm:$0xff] }
  0xc6   :  { %v2933_v40 = vld [vmem:[#allocation38_spill] sm:$0xff] }
  0xc7   :  { %966 = vmatpush.msrb.mxu3 %v2919_v47  ;;  %v140_v4 = vpop.f32.mrf.mxu0  ;;  %v2929_v47 = vld [vmem:[#allocation23_spill] sm:$0xff] }
  0xc8   :  { %657 = vmatmul.f32.vlgmr.msra.gmra.mxu0 %v140_v4  ;;  %883 = vmatmul.f32.vlgmr.msra.gmra.mxu3 %v2250_v19  ;;  %v2424_v4 = vpop.f32.mrf.mxu2  ;;  %v2930_v19 = vld [vmem:[#allocation36_spill] sm:$0xff] }
  0xc9   :  { %967 = vmatpush.msrb.mxu3 %v2921_v6  ;;  %982 = vmatpush.msra.mxu0 %v2922_v9 }
  0xca   :  { %949 = vmatpush.msrb.mxu2 %v2929_v47  ;;  %v2936_v47 = vld [vmem:[#allocation28_spill] sm:$0xff] }
  0xcb   :  { %968 = vmatpush.msrb.mxu3 %v2924_v33  ;;  %983 = vmatpush.msra.mxu0 %v2925_v36  ;;  %v2431_v33 = vpop.f32.mrf.mxu1 }
  0xcc   :  { %950 = vmatpush.msrb.mxu2 %v2935_v56  ;;  %v2940_v56 = vld [vmem:[#allocation42_spill] sm:$0xff] }
  0xcd   :  { %969 = vmatpush.msrb.mxu3 %v2927_v43  ;;  %984 = vmatpush.msra.mxu0 %v2928_v60  ;;  %v2934_v43 = vld [vmem:[#allocation39_spill] sm:$0xff] }
  0xce   :  { %951 = vmatpush.msrb.mxu2 %v2936_v47  ;;  %v2943_v47 = vld [vmem:[#allocation44_spill] sm:$0xff] }
  0xcf   :  { %970 = vmatpush.msrb.mxu3 %v2930_v19  ;;  %985 = vmatpush.msra.mxu0 %v2931_v5  ;;  %v143_v6 = vpop.f32.mrf.mxu0  ;;  %v2937_v19 = vld [vmem:[#allocation40_spill] sm:$0xff] }
  0xd0   :  { %660 = vmatmul.f32.gmra.mxu0 %v143_v6  ;;  %886 = vmatmul.f32.gmra.mxu3 %v2288_v18  ;;  %v2444_v6 = vpop.f32.mrf.mxu2 }
  0xd1   :  { %971 = vmatpush.msrb.mxu3 %v2933_v40  ;;  %986 = vmatpush.msra.mxu0 %v2934_v43 }
  0xd3   :  { %972 = vmatpush.msrb.mxu3 %v2233_v20  ;;  %987 = vmatpush.msra.mxu0 %v2237_v44  ;;  %v2448_v20 = vpop.f32.mrf.mxu3  ;;  %v199_v40 = vpop.f32.mrf.mxu1 }
  0xd4   :  { %2939 = vst [vmem:[#allocation12_spill] sm:$0xff] %v2448_v20  ;;  %v2505_v20 = vld [vmem:[#allocation4 + $0x58] sm:$0xff] }
  0xd5   :  { %973 = vmatpush.msrb.mxu3 %v2937_v19  ;;  %988 = vmatpush.msra.mxu0 %v2938_v29 }
  0xd7   :  { %974 = vmatpush.msrb.mxu3 %v2254_v63  ;;  %989 = vmatpush.msra.mxu0 %v2258_v52  ;;  %v146_v18 = vpop.f32.mrf.mxu0  ;;  %v2941_v63 = vld [vmem:[#allocation43_spill] sm:$0xff] }
  0xd8   :  { %680 = vmatmul.f32.vlgmr.msra.gmra.mxu1 %v146_v18  ;;  %906 = vmatmul.f32.vlgmr.msrb.gmra.mxu0 %v2330_v46  ;;  %v2948_v18 = vld [vmem:[#allocation11_spill] sm:$0xff] }
  0xd9   :  { %1209 = vmatpush.msra.mxu3 %v1951_v25  ;;  %1005 = vmatpush.msra.mxu1 %v2269_v24  ;;  %v2942_v25 = vld [vmem:[#allocation45_spill] sm:$0xff] }
  0xda   :  { %990 = vmatpush.msra.mxu0 %v2940_v56  ;;  %975 = vmatmul.f32.vlgmr.msrb.gmra.mxu3 %v199_v40  ;;  %v2949_v40 = vld [vmem:[#allocation13_spill] sm:$0xff] }
  0xdb   :  { %1210 = vmatpush.msra.mxu3 %v1960_v28  ;;  %1006 = vmatpush.msra.mxu1 %v2276_v27  ;;  %v2944_v28 = vld [vmem:[#allocation46_spill] sm:$0xff]  ;;  %v2467_v19 = vpop.f32.mrf.mxu3 }
  0xdc   :  { %991 = vmatpush.msra.mxu0 %v2941_v63  ;;  %2945 = vst [vmem:[#allocation26_spill] sm:$0xff] %v2467_v19  ;;  %v2488_v19 = vld [vmem:[#allocation4 + $0x68] sm:$0xff] }
  0xdd   :  { %1211 = vmatpush.msra.mxu3 %v1971_v31  ;;  %1007 = vmatpush.msra.mxu1 %v2942_v25  ;;  %v2465_v31 = vpop.f32.mrf.mxu2 }
  0xde   :  { %992 = vmatpush.msra.mxu0 %v2943_v47 }
  0xdf   :  { %1212 = vmatpush.msra.mxu3 %v1985_v35  ;;  %1008 = vmatpush.msra.mxu1 %v2294_v34  ;;  %v149_v46 = vpop.f32.mrf.mxu0  ;;  %v2946_v35 = vld [vmem:[#allocation47_spill] sm:$0xff] }
  0xe0   :  { %993 = vmatpush.msra.mxu0 %v2292_v23  ;;  %683 = vmatmul.f32.gmra.mxu1 %v149_v46  ;;  %v2950_v46 = vld [vmem:[#allocation14_spill] sm:$0xff] }
  0xe1   :  { %1213 = vmatpush.msra.mxu3 %v1996_v38  ;;  %909 = vmatmul.f32.gmra.mxu0 %v2356_v57  ;;  %v2947_v38 = vld [vmem:[#allocation48_spill] sm:$0xff] }
  0xe2   :  { %994 = vmatpush.msra.mxu0 %v2301_v37  ;;  %1009 = vmatpush.msra.mxu1 %v2944_v28 }
  0xe3   :  { %1214 = vmatpush.msra.mxu3 %v2009_v41  ;;  %v2477_v41 = vld [vmem:[#allocation4 + $0x78] sm:$0xff] }
  0xe4   :  { %995 = vmatpush.msra.mxu0 %v2946_v35  ;;  %1010 = vmatpush.msra.mxu1 %v2312_v39 }
  0xe5   :  { %1215 = vmatpush.msra.mxu3 %v2025_v45  ;;  %v2482_v45 = vld [vmem:[#allocation4 + $0x70] sm:$0xff] }
  0xe6   :  { %996 = vmatpush.msra.mxu0 %v2947_v38  ;;  %1011 = vmatpush.msra.mxu1 %v2320_v21 }
  0xe7   :  { %1216 = vmatpush.msra.mxu3 %v2046_v50  ;;  %v152_v57 = vpop.f32.mrf.mxu0  ;;  %v202_v50 = vpop.f32.mrf.mxu1 }
  0xe8   :  { %997 = vmatpush.msra.mxu0 %v2324_v42  ;;  %1012 = vmatpush.msra.mxu1 %v2328_v51 }
  0xe9   :  { %1217 = vmatpush.msra.mxu3 %v2062_v53  ;;  %703 = vmatmul.f32.vlgmr.msra.gmra.mxu2 %v152_v57  ;;  %v2492_v53 = vpop.f32.mrf.mxu2  ;;  %v2951_v57 = vld [vmem:[#allocation16_spill] sm:$0xff] }
  0xea   :  { %1232 = vmatpush.msrb.mxu0 %v2948_v18  ;;  %929 = vmatmul.f32.vlgmr.msrb.gmra.mxu1 %v2379_v11  ;;  %v2494_v11 = vpop.f32.mrf.mxu3  ;;  %v2500_v18 = vld [vmem:[#allocation4 + $0x60] sm:$0xff] }
  0xeb   :  { %1013 = vmatpush.msra.mxu1 %v2336_v48  ;;  %1186 = vmatpush.msra.mxu2 %v2477_v41 }
  0xec   :  { %1218 = vmatpush.msra.mxu3 %v2949_v40  ;;  %1233 = vmatpush.msrb.mxu0 %v2950_v46  ;;  %v2952_v40 = vld [vmem:[#allocation18_spill] sm:$0xff] }
  0xed   :  { %1014 = vmatpush.msra.mxu1 %v2341_v3  ;;  %1187 = vmatpush.msra.mxu2 %v2482_v45 }
  0xee   :  { %1219 = vmatpush.msra.mxu3 %v2085_v61  ;;  %1234 = vmatpush.msrb.mxu0 %v2951_v57  ;;  %v2953_v61 = vld [vmem:[#allocation20_spill] sm:$0xff] }
  0xef   :  { %1015 = vmatpush.msra.mxu1 %v2346_v49  ;;  %1188 = vmatpush.msra.mxu2 %v2488_v19  ;;  %v155_v46 = vpop.f32.mrf.mxu0  ;;  %v2510_v57 = vld [vmem:[#allocation4 + $0x50] sm:$0xff] }
  0xf0   :  { %1220 = vmatpush.msra.mxu3 %v2100_v1  ;;  %1235 = vmatpush.msrb.mxu0 %v2952_v40  ;;  %v205_v1 = vpop.f32.mrf.mxu1  ;;  %v2954_v40 = vld [vmem:[#allocation22_spill] sm:$0xff] }
  0xf1   :  { %978 = vmatmul.f32.gmra.mxu3 %v202_v50  ;;  %1016 = vmatpush.msra.mxu1 %v2352_v30  ;;  %v2516_v50 = vld [vmem:[#allocation4 + $0x48] sm:$0xff] }
  0xf2   :  { %1189 = vmatpush.msra.mxu2 %v2500_v18  ;;  %1221 = vmatpush.msra.mxu3 %v2953_v61  ;;  %v2534_v61 = vld [vmem:[#allocation4 + $0x1f8] sm:$0xff] }
  0xf3   :  { %1236 = vmatpush.msrb.mxu0 %v2123_v7  ;;  %706 = vmatmul.f32.gmra.mxu2 %v155_v46  ;;  %v2522_v7 = vld [vmem:[#allocation4 + $0x40] sm:$0xff]  ;;  %v2526_v46 = vpop.f32.mrf.mxu3 }
  0xf4   :  { %932 = vmatmul.f32.gmra.mxu1 %v2393_v26  ;;  %1190 = vmatpush.msra.mxu2 %v2505_v20  ;;  %v2524_v26 = vpop.f32.mrf.mxu2 }
  0xf5   :  { %1017 = vmatpush.msra.mxu1 %v2358_v58  ;;  %1222 = vmatpush.msra.mxu3 %v2134_v10  ;;  %v2955_v10 = vld [vmem:[#allocation27_spill] sm:$0xff] }
  0xf6   :  { %1237 = vmatpush.msrb.mxu0 %v2954_v40  ;;  %1191 = vmatpush.msra.mxu2 %v2510_v57  ;;  %v2588_v40 = vld [vmem:[#allocation4 + $0x1c8] sm:$0xff] }
  0xf7   :  { %1018 = vmatpush.msra.mxu1 %v2363_v62  ;;  %1223 = vmatpush.msra.mxu3 %v2147_v14  ;;  %v2539_v14 = vld [vmem:[#allocation4 + $0x38] sm:$0xff] }
  0xf8   :  { %1238 = vmatpush.msrb.mxu0 %v2149_v15  ;;  %1192 = vmatpush.msra.mxu2 %v2516_v50  ;;  %v2543_v15 = vld [vmem:[#allocation4 + $0x1f0] sm:$0xff] }
  0xf9   :  { %1019 = vmatpush.msra.mxu1 %v2368_v2  ;;  %1224 = vmatpush.msra.mxu3 %v2955_v10  ;;  %v2619_v10 = vld [vmem:[#allocation4 + $0x1b0] sm:$0xff] }
  0xfa   :  { %1239 = vmatpush.msrb.mxu0 %v2161_v8  ;;  %1193 = vmatpush.msra.mxu2 %v2522_v7  ;;  %v2547_v8 = vld [vmem:[#allocation4 + $0x30] sm:$0xff] }
  0xfb   :  { %998 = vmatmul.f32.vlgmr.msra.gmra.mxu0 %v205_v1  ;;  %1020 = vmatpush.msra.mxu1 %v2373_v54  ;;  %v2563_v1 = vpop.f32.mrf.mxu3 }
  0xfc   :  { %1225 = vmatmul.f32.vlgmr.msra.gmra.mxu3 %v2444_v6  ;;  %1240 = vmatpush.msrb.mxu0 %v2173_v12  ;;  %v208_v6 = vpop.f32.mrf.mxu1  ;;  %v2551_v12 = vld [vmem:[#allocation4 + $0x1e8] sm:$0xff] }
  0xfd   :  { %1301 = vmatpush.msrb.mxu3 %v2922_v9  ;;  %1255 = vmatpush.msrb.mxu1 %v2534_v61  ;;  %v2555_v9 = vld [vmem:[#allocation4 + $0x28] sm:$0xff] }
  0xfe   :  { %952 = vmatmul.f32.vlgmr.msrb.gmra.mxu2 %v2410_v0  ;;  %1241 = vmatpush.msrb.mxu0 %v2185_v22  ;;  %v2559_v22 = vld [vmem:[#allocation4 + $0x1e0] sm:$0xff]  ;;  %v2561_v0 = vpop.f32.mrf.mxu2 }
  0xff   :  { %1194 = vmatpush.msra.mxu2 %v2539_v14  ;;  %1302 = vmatpush.msrb.mxu3 %v2925_v36  ;;  %v2567_v36 = vld [vmem:[#allocation4 + $0x20] sm:$0xff] }
 0x100   :  { %1256 = vmatpush.msrb.mxu1 %v2543_v15  ;;  %1242 = vmatpush.msrb.mxu0 %v2195_v32  ;;  %v2572_v32 = vld [vmem:[#allocation4 + $0x1d8] sm:$0xff] }
 0x101   :  { %1195 = vmatpush.msra.mxu2 %v2547_v8  ;;  %1303 = vmatpush.msrb.mxu3 %v2928_v60  ;;  %v2576_v60 = vld [vmem:[#allocation4 + $0x18] sm:$0xff] }
 0x102   :  { %1257 = vmatpush.msrb.mxu1 %v2551_v12  ;;  %1243 = vmatpush.msrb.mxu0 %v2205_v16  ;;  %v2580_v16 = vld [vmem:[#allocation4 + $0x1d0] sm:$0xff] }
 0x103   :  { %1196 = vmatpush.msra.mxu2 %v2555_v9  ;;  %1304 = vmatpush.msrb.mxu3 %v2931_v5  ;;  %v2584_v5 = vld [vmem:[#allocation4 + $0x10] sm:$0xff] }
 0x104   :  { %1258 = vmatpush.msrb.mxu1 %v2559_v22  ;;  %1001 = vmatmul.f32.gmra.mxu0 %v208_v6  ;;  %v2627_v6 = vld [vmem:[#allocation4 + $0x1a8] sm:$0xff] }
 0x105   :  { %1197 = vmatpush.msra.mxu2 %v2567_v36  ;;  %1228 = vmatmul.f32.gmra.mxu3 %v2465_v31 }
 0x106   :  { %1305 = vmatpush.msrb.mxu3 %v2934_v43  ;;  %1244 = vmatpush.msrb.mxu0 %v2217_v13  ;;  %v211_v43 = vpop.f32.mrf.mxu1  ;;  %v2592_v13 = vld [vmem:[#allocation4 + $0x8] sm:$0xff]  ;;  %v2602_v31 = vpop.f32.mrf.mxu2 }
 0x107   :  { %1259 = vmatpush.msrb.mxu1 %v2572_v32  ;;  %955 = vmatmul.f32.gmra.mxu2 %v2431_v33  ;;  %v2598_v33 = vld [vmem:[#allocation4 + $0x1c0] sm:$0xff] }
 0x108   :  { %1198 = vmatpush.msra.mxu2 %v2576_v60  ;;  %1306 = vmatpush.msrb.mxu3 %v2237_v44  ;;  %v2600_v44 = vld [vmem:[#allocation4] sm:$0xff] }
 0x109   :  { %1245 = vmatpush.msrb.mxu0 %v2229_v59  ;;  %1260 = vmatpush.msrb.mxu1 %v2580_v16  ;;  %v2604_v59 = vpop.f32.mrf.mxu3 }
 0x10a   :  { %1199 = vmatpush.msra.mxu2 %v2584_v5  ;;  %1307 = vmatpush.msrb.mxu3 %v2938_v29  ;;  %v2609_v29 = vld [vmem:[#allocation4 + $0x1b8] sm:$0xff] }
 0x10b   :  { %1246 = vmatpush.msrb.mxu0 %v2239_v55  ;;  %1261 = vmatpush.msrb.mxu1 %v2588_v40  ;;  %v2613_v55 = vld [vmem:[#allocation4 + $0x278] sm:$0xff] }
 0x10c   :  { %1021 = vmatmul.f32.vlgmr.msra.gmra.mxu1 %v211_v43  ;;  %1200 = vmatpush.msra.mxu2 %v2592_v13 }
 0x10d   :  { %1308 = vmatpush.msrb.mxu3 %v2258_v52  ;;  %1247 = vmatpush.msrb.mxu0 %v2248_v17  ;;  %v2621_v52 = vld [vmem:[#allocation4 + $0x270] sm:$0xff]  ;;  %v2956_v17 = vld [vmem:[#allocation10_spill] sm:$0xff] }
 0x10e   :  { %1262 = vmatpush.msrb.mxu1 %v2598_v33  ;;  %1201 = vmatpush.msra.mxu2 %v2600_v44 }
 0x10f   :  { %1248 = vmatmul.f32.vlgmr.msrb.gmra.mxu0 %v2492_v53  ;;  %1309 = vmatpush.msrb.mxu3 %v2940_v56  ;;  %v2629_v53 = vld [vmem:[#allocation4 + $0x268] sm:$0xff]  ;;  %v2635_v56 = vld [vmem:[#allocation4 + $0x1a0] sm:$0xff] }
 0x110   :  { %1324 = vmatpush.msra.mxu0 %v2269_v24  ;;  %1263 = vmatpush.msrb.mxu1 %v2609_v29  ;;  %v214_v24 = vpop.f32.mrf.mxu1 }
 0x111   :  { %1278 = vmatpush.msrb.mxu2 %v2613_v55  ;;  %1310 = vmatpush.msrb.mxu3 %v2941_v63  ;;  %v2641_v63 = vpop.f32.mrf.mxu2  ;;  %v2643_v43 = vpop.f32.mrf.mxu3 }
 0x112   :  { %1202 = vmatmul.f32.vlgmr.msra.gmra.mxu2 %v2956_v17  ;;  %1325 = vmatpush.msra.mxu0 %v2276_v27  ;;  %v2639_v27 = vld [vmem:[#allocation4 + $0x260] sm:$0xff]  ;;  %v2656_v17 = vld [vmem:[#allocation4 + $0x190] sm:$0xff] }
 0x113   :  { %1264 = vmatpush.msrb.mxu1 %v2619_v10  ;;  %1279 = vmatpush.msrb.mxu2 %v2621_v52 }
 0x114   :  { %1311 = vmatpush.msrb.mxu3 %v2943_v47  ;;  %1326 = vmatpush.msra.mxu0 %v2942_v25  ;;  %v2648_v25 = vld [vmem:[#allocation4 + $0x198] sm:$0xff] }
 0x115   :  { %1265 = vmatpush.msrb.mxu1 %v2627_v6  ;;  %1280 = vmatpush.msrb.mxu2 %v2629_v53  ;;  %v2650_v47 = vld [vmem:[#allocation4 + $0x258] sm:$0xff] }
 0x116   :  { %1024 = vmatmul.f32.gmra.mxu1 %v214_v24  ;;  %1312 = vmatpush.msrb.mxu3 %v2292_v23  ;;  %v2660_v23 = vld [vmem:[#allocation4 + $0x250] sm:$0xff] }
 0x117   :  { %1327 = vmatpush.msra.mxu0 %v2294_v34  ;;  %1266 = vmatpush.msrb.mxu1 %v2635_v56  ;;  %v2664_v34 = vld [vmem:[#allocation4 + $0x188] sm:$0xff]  ;;  %v2691_v24 = vld [vmem:[#allocation4 + $0x230] sm:$0xff] }
 0x118   :  { %1281 = vmatpush.msrb.mxu2 %v2639_v27  ;;  %1251 = vmatmul.f32.gmra.mxu0 %v2524_v26 }
 0x119   :  { %1313 = vmatpush.msrb.mxu3 %v2301_v37  ;;  %1328 = vmatpush.msra.mxu0 %v2944_v28  ;;  %v2668_v37 = vld [vmem:[#allocation4 + $0x248] sm:$0xff]  ;;  %v2672_v28 = vld [vmem:[#allocation4 + $0x180] sm:$0xff]  ;;  %v2682_v26 = vpop.f32.mrf.mxu3 }
 0x11a   :  { %1267 = vmatpush.msrb.mxu1 %v2648_v25  ;;  %1282 = vmatpush.msrb.mxu2 %v2650_v47 }
 0x11b   :  { %1205 = vmatmul.f32.gmra.mxu2 %v2424_v4  ;;  %1314 = vmatpush.msrb.mxu3 %v2946_v35  ;;  %v2676_v4 = vld [vmem:[#allocation4 + $0x240] sm:$0xff]  ;;  %v1440_v35 = vld [vmem:[#allocation4 + $0x178] sm:$0xff] }
 0x11c   :  { %1329 = vmatpush.msra.mxu0 %v2312_v39  ;;  %1268 = vmatpush.msrb.mxu1 %v2656_v17  ;;  %v2680_v39 = vpop.f32.mrf.mxu2 }
 0x11d   :  { %1283 = vmatpush.msrb.mxu2 %v2660_v23  ;;  %1315 = vmatpush.msrb.mxu3 %v2947_v38  ;;  %v2686_v38 = vld [vmem:[#allocation4 + $0x238] sm:$0xff] }
 0x11e   :  { %1330 = vmatpush.msra.mxu0 %v2320_v21  ;;  %1269 = vmatpush.msrb.mxu1 %v2664_v34  ;;  %v1439_v21 = vld [vmem:[#allocation4 + $0x170] sm:$0xff] }
 0x11f   :  { %1284 = vmatpush.msrb.mxu2 %v2668_v37  ;;  %1316 = vmatpush.msrb.mxu3 %v2324_v42  ;;  %v1438_v42 = vld [vmem:[#allocation4 + $0x168] sm:$0xff] }
 0x120   :  { %1331 = vmatpush.msra.mxu0 %v2328_v51  ;;  %1270 = vmatpush.msrb.mxu1 %v2672_v28  ;;  %v2696_v51 = vld [vmem:[#allocation4 + $0x228] sm:$0xff] }
 0x121   :  { %1285 = vmatpush.msrb.mxu2 %v2676_v4  ;;  %1551 = vmatpush.msra.mxu3 %v1440_v35  ;;  %v1437_v35 = vld [vmem:[#allocation4 + $0x160] sm:$0xff] }
 0x122   :  { %1271 = vmatmul.f32.vlgmr.msrb.gmra.mxu1 %v2561_v0  ;;  %1332 = vmatpush.msra.mxu0 %v2336_v48  ;;  %v2701_v48 = vld [vmem:[#allocation4 + $0x220] sm:$0xff] }
 0x123   :  { %1505 = vmatpush.msra.mxu1 %v2477_v41  ;;  %1286 = vmatpush.msrb.mxu2 %v2686_v38  ;;  %v1436_v41 = vld [vmem:[#allocation4 + $0x158] sm:$0xff] }
 0x124   :  { %1552 = vmatpush.msra.mxu3 %v1439_v21  ;;  %1333 = vmatpush.msra.mxu0 %v2341_v3  ;;  %v2708_v3 = vld [vmem:[#allocation4 + $0x218] sm:$0xff]  ;;  %v264_v0 = vpop.f32.mrf.mxu2  ;;  %v2710_v21 = vpop.f32.mrf.mxu3 }
 0x125   :  { %1506 = vmatpush.msra.mxu1 %v2482_v45  ;;  %1287 = vmatpush.msrb.mxu2 %v2691_v24  ;;  %v1435_v45 = vld [vmem:[#allocation4 + $0x150] sm:$0xff] }
 0x126   :  { %1553 = vmatpush.msra.mxu3 %v1438_v42  ;;  %1334 = vmatpush.msra.mxu0 %v2346_v49  ;;  %v2715_v49 = vld [vmem:[#allocation4 + $0x210] sm:$0xff]  ;;  %v1430_v42 = vld [vmem:[#allocation4 + $0x128] sm:$0xff] }
 0x127   :  { %1507 = vmatpush.msra.mxu1 %v2488_v19  ;;  %1288 = vmatpush.msrb.mxu2 %v2696_v51  ;;  %v2720_v19 = vld [vmem:[#allocation4 + $0x208] sm:$0xff] }
 0x128   :  { %1554 = vmatpush.msra.mxu3 %v1437_v35  ;;  %1335 = vmatpush.msra.mxu0 %v2352_v30  ;;  %v1434_v30 = vld [vmem:[#allocation4 + $0x148] sm:$0xff]  ;;  %v1425_v35 = vld [vmem:[#allocation4 + $0x100] sm:$0xff] }
 0x129   :  { %1508 = vmatpush.msra.mxu1 %v2500_v18  ;;  %1289 = vmatpush.msrb.mxu2 %v2701_v48  ;;  %v1433_v18 = vld [vmem:[#allocation4 + $0x140] sm:$0xff] }
 0x12a   :  { %1555 = vmatpush.msra.mxu3 %v1436_v41  ;;  %1274 = vmatmul.f32.gmra.mxu1 %v2602_v31  ;;  %v1423_v31 = vld [vmem:[#allocation4 + $0xf0] sm:$0xff] }
 0x12b   :  { %1336 = vmatpush.msra.mxu0 %v2358_v58  ;;  %1509 = vmatpush.msra.mxu1 %v2505_v20  ;;  %v2725_v58 = vld [vmem:[#allocation4 + $0x200] sm:$0xff]  ;;  %v1432_v20 = vld [vmem:[#allocation4 + $0x138] sm:$0xff] }
 0x12c   :  { %1290 = vmatpush.msrb.mxu2 %v2708_v3  ;;  %1556 = vmatpush.msra.mxu3 %v1435_v45  ;;  %v2763_v45 = vpop.f32.mrf.mxu0 }
 0x12d   :  { %1337 = vmatpush.msra.mxu0 %v2363_v62  ;;  %1510 = vmatpush.msra.mxu1 %v2510_v57  ;;  %v1424_v62 = vld [vmem:[#allocation4 + $0xf8] sm:$0xff]  ;;  %v1431_v57 = vld [vmem:[#allocation4 + $0x130] sm:$0xff] }
 0x12e   :  { %1291 = vmatpush.msrb.mxu2 %v2715_v49  ;;  %1557 = vmatpush.msra.mxu3 %v1434_v30  ;;  %v589_v30 = vpop.f32.mrf.mxu1 }
 0x12f   :  { %1338 = vmatpush.msra.mxu0 %v2368_v2  ;;  %1511 = vmatpush.msra.mxu1 %v2516_v50  ;;  %v267_v2 = vpop.f32.mrf.mxu2  ;;  %v2732_v50 = vpop.f32.mrf.mxu3 }
 0x130   :  { %1292 = vmatpush.msrb.mxu2 %v2720_v19  ;;  %1558 = vmatpush.msra.mxu3 %v1433_v18  ;;  %v1488_v18 = vld [vmem:[#allocation4 + $0x2f8] sm:$0xff] }
 0x131   :  { %1317 = vmatmul.f32.vlgmr.msrb.gmra.mxu3 %v264_v0  ;;  %1339 = vmatpush.msra.mxu0 %v2373_v54  ;;  %v1422_v54 = vld [vmem:[#allocation4 + $0xe8] sm:$0xff]  ;;  %v2958_v0 = vld [vmem:[#allocation12_spill] sm:$0xff] }
 0x132   :  { %1512 = vmatpush.msra.mxu1 %v2522_v7  ;;  %1293 = vmatpush.msrb.mxu2 %v2725_v58  ;;  %v1429_v7 = vld [vmem:[#allocation4 + $0x120] sm:$0xff] }
 0x133   :  { %1559 = vmatpush.msra.mxu3 %v1432_v20  ;;  %1574 = vmatpush.msrb.mxu0 %v2534_v61  ;;  %v1421_v61 = vld [vmem:[#allocation4 + $0xe0] sm:$0xff] }
 0x134   :  { %1294 = vmatmul.f32.vlgmr.msrb.gmra.mxu2 %v2641_v63  ;;  %1513 = vmatpush.msra.mxu1 %v2539_v14  ;;  %v1428_v14 = vld [vmem:[#allocation4 + $0x118] sm:$0xff]  ;;  %v2959_v20 = vld [vmem:[#allocation26_spill] sm:$0xff] }
 0x135   :  { %1528 = vmatpush.msra.mxu2 %v1424_v62  ;;  %1560 = vmatpush.msra.mxu3 %v1431_v57  ;;  %v1486_v62 = vld [vmem:[#allocation4 + $0x2e8] sm:$0xff] }
 0x136   :  { %1575 = vmatpush.msrb.mxu0 %v2543_v15  ;;  %1514 = vmatpush.msra.mxu1 %v2547_v8  ;;  %v1420_v15 = vld [vmem:[#allocation4 + $0xd8] sm:$0xff]  ;;  %v1427_v8 = vld [vmem:[#allocation4 + $0x110] sm:$0xff] }
 0x137   :  { %1529 = vmatpush.msra.mxu2 %v1423_v31  ;;  %1561 = vmatpush.msra.mxu3 %v1430_v42  ;;  %v2745_v63 = vpop.f32.mrf.mxu3  ;;  %v1492_v31 = vld [vmem:[#allocation4 + $0x318] sm:$0xff] }
 0x138   :  { %1576 = vmatpush.msrb.mxu0 %v2551_v12  ;;  %1515 = vmatpush.msra.mxu1 %v2555_v9  ;;  %v1419_v12 = vld [vmem:[#allocation4 + $0xd0] sm:$0xff]  ;;  %v270_v9 = vpop.f32.mrf.mxu2 }
 0x139   :  { %1530 = vmatpush.msra.mxu2 %v1422_v54  ;;  %1562 = vmatpush.msra.mxu3 %v1429_v7  ;;  %v1491_v54 = vld [vmem:[#allocation4 + $0x310] sm:$0xff]  ;;  %v1490_v7 = vld [vmem:[#allocation4 + $0x308] sm:$0xff] }
 0x13a   :  { %1577 = vmatpush.msrb.mxu0 %v2559_v22  ;;  %1320 = vmatmul.f32.gmra.mxu3 %v267_v2  ;;  %v1426_v22 = vld [vmem:[#allocation4 + $0x108] sm:$0xff] }
 0x13b   :  { %1516 = vmatpush.msra.mxu1 %v2567_v36  ;;  %1531 = vmatpush.msra.mxu2 %v1421_v61  ;;  %v1418_v36 = vld [vmem:[#allocation4 + $0xc8] sm:$0xff] }
 0x13c   :  { %1563 = vmatpush.msra.mxu3 %v1428_v14  ;;  %1578 = vmatpush.msrb.mxu0 %v2572_v32  ;;  %v1417_v32 = vld [vmem:[#allocation4 + $0xc0] sm:$0xff] }
 0x13d   :  { %1297 = vmatmul.f32.gmra.mxu2 %v2680_v39  ;;  %1517 = vmatpush.msra.mxu1 %v2576_v60  ;;  %v1504_v60 = vld [vmem:[#allocation4 + $0x378] sm:$0xff]  ;;  %v1503_v39 = vld [vmem:[#allocation4 + $0x370] sm:$0xff]  ;;  %v1489_v14 = vld [vmem:[#allocation4 + $0x300] sm:$0xff] }
 0x13e   :  { %1532 = vmatpush.msra.mxu2 %v1420_v15  ;;  %1564 = vmatpush.msra.mxu3 %v1427_v8 }
 0x13f   :  { %1579 = vmatpush.msrb.mxu0 %v2580_v16  ;;  %1518 = vmatpush.msra.mxu1 %v2584_v5  ;;  %v1416_v16 = vld [vmem:[#allocation4 + $0xb8] sm:$0xff]  ;;  %v2957_v5 = vld [vmem:[#allocation24_spill] sm:$0xff] }
 0x140   :  { %1340 = vmatmul.f32.vlgmr.msra.gmra.mxu0 %v270_v9  ;;  %1533 = vmatpush.msra.mxu2 %v1419_v12  ;;  %v273_v41 = vpop.f32.mrf.mxu2  ;;  %v1480_v9 = vld [vmem:[#allocation4 + $0x2b8] sm:$0xff] }
 0x141   :  { %1565 = vmatpush.msra.mxu3 %v1426_v22  ;;  %1580 = vmatpush.msrb.mxu0 %v2588_v40  ;;  %v1415_v40 = vld [vmem:[#allocation4 + $0xb0] sm:$0xff] }
 0x142   :  { %1519 = vmatpush.msra.mxu1 %v2592_v13  ;;  %1534 = vmatpush.msra.mxu2 %v1418_v36  ;;  %v1502_v13 = vld [vmem:[#allocation4 + $0x368] sm:$0xff]  ;;  %v1479_v36 = vld [vmem:[#allocation4 + $0x2b0] sm:$0xff] }
 0x143   :  { %1566 = vmatpush.msra.mxu3 %v1425_v35  ;;  %1581 = vmatpush.msrb.mxu0 %v2598_v33  ;;  %v2757_v33 = vpop.f32.mrf.mxu3 }
 0x144   :  { %1520 = vmatpush.msra.mxu1 %v2600_v44  ;;  %1535 = vmatpush.msra.mxu2 %v1417_v32  ;;  %v1501_v44 = vld [vmem:[#allocation4 + $0x360] sm:$0xff]  ;;  %v1478_v32 = vld [vmem:[#allocation4 + $0x2a8] sm:$0xff] }
 0x145   :  { %1567 = vmatmul.f32.vlgmr.msra.gmra.mxu3 %v2526_v46  ;;  %1521 = vmatmul.f32.vlgmr.msra.gmra.mxu1 %v2957_v5  ;;  %v1414_v46 = vld [vmem:[#allocation4 + $0xa8] sm:$0xff]  ;;  %v1477_v5 = vld [vmem:[#allocation4 + $0x2a0] sm:$0xff] }
 0x146   :  { %1643 = vmatpush.msrb.mxu3 %v1504_v60  ;;  %1582 = vmatpush.msrb.mxu0 %v2609_v29  ;;  %v1413_v29 = vld [vmem:[#allocation4 + $0xa0] sm:$0xff] }
 0x147   :  { %1597 = vmatpush.msrb.mxu1 %v2613_v55  ;;  %1536 = vmatpush.msra.mxu2 %v1416_v16  ;;  %v1500_v55 = vld [vmem:[#allocation4 + $0x358] sm:$0xff] }
 0x148   :  { %1644 = vmatpush.msrb.mxu3 %v1503_v39  ;;  %1583 = vmatpush.msrb.mxu0 %v2619_v10  ;;  %v1412_v10 = vld [vmem:[#allocation4 + $0x98] sm:$0xff]  ;;  %v612_v57 = vpop.f32.mrf.mxu2 }
 0x149   :  { %1598 = vmatpush.msrb.mxu1 %v2621_v52  ;;  %1343 = vmatmul.f32.gmra.mxu0 %v273_v41  ;;  %v1499_v52 = vld [vmem:[#allocation4 + $0x350] sm:$0xff] }
 0x14a   :  { %1537 = vmatpush.msra.mxu2 %v1415_v40  ;;  %1645 = vmatpush.msrb.mxu3 %v1502_v13 }
 0x14b   :  { %1584 = vmatpush.msrb.mxu0 %v2627_v6  ;;  %1599 = vmatpush.msrb.mxu1 %v2629_v53  ;;  %v1411_v6 = vld [vmem:[#allocation4 + $0x90] sm:$0xff]  ;;  %v1498_v53 = vld [vmem:[#allocation4 + $0x348] sm:$0xff] }
 0x14c   :  { %1538 = vmatpush.msra.mxu2 %v1414_v46  ;;  %1646 = vmatpush.msrb.mxu3 %v1501_v44  ;;  %v1475_v46 = vld [vmem:[#allocation4 + $0x290] sm:$0xff] }
 0x14d   :  { %1585 = vmatpush.msrb.mxu0 %v2635_v56  ;;  %1600 = vmatpush.msrb.mxu1 %v2639_v27  ;;  %v2771_v56 = vpop.f32.mrf.mxu3  ;;  %v1497_v27 = vld [vmem:[#allocation4 + $0x340] sm:$0xff] }
 0x14e   :  { %1539 = vmatpush.msra.mxu2 %v1413_v29  ;;  %1570 = vmatmul.f32.gmra.mxu3 %v2563_v1  ;;  %v1410_v1 = vld [vmem:[#allocation4 + $0x88] sm:$0xff] }
 0x14f   :  { %1647 = vmatpush.msrb.mxu3 %v1500_v55  ;;  %1524 = vmatmul.f32.gmra.mxu1 %v2958_v0  ;;  %v1474_v55 = vld [vmem:[#allocation4 + $0x288] sm:$0xff] }
 0x150   :  { %1586 = vmatpush.msrb.mxu0 %v2648_v25  ;;  %1601 = vmatpush.msrb.mxu1 %v2650_v47  ;;  %v1409_v25 = vld [vmem:[#allocation4 + $0x80] sm:$0xff]  ;;  %v1496_v47 = vld [vmem:[#allocation4 + $0x338] sm:$0xff] }
 0x151   :  { %1540 = vmatpush.msra.mxu2 %v1412_v10  ;;  %1648 = vmatpush.msrb.mxu3 %v1499_v52  ;;  %v1473_v10 = vld [vmem:[#allocation4 + $0x280] sm:$0xff] }
 0x152   :  { %1587 = vmatpush.msrb.mxu0 %v2656_v17  ;;  %1602 = vmatpush.msrb.mxu1 %v2660_v23  ;;  %v2779_v17 = vpop.f32.mrf.mxu0  ;;  %v1495_v23 = vld [vmem:[#allocation4 + $0x330] sm:$0xff] }
 0x153   :  { %1541 = vmatpush.msra.mxu2 %v1411_v6  ;;  %1649 = vmatpush.msrb.mxu3 %v1498_v53 }
 0x154   :  { %1588 = vmatpush.msrb.mxu0 %v2664_v34  ;;  %1603 = vmatpush.msrb.mxu1 %v2668_v37  ;;  %v1487_v34 = vld [vmem:[#allocation4 + $0x2f0] sm:$0xff]  ;;  %v1494_v37 = vld [vmem:[#allocation4 + $0x328] sm:$0xff] }
 0x155   :  { %1542 = vmatpush.msra.mxu2 %v1410_v1  ;;  %1650 = vmatpush.msrb.mxu3 %v1497_v27  ;;  %v635_v2 = vpop.f32.mrf.mxu3 }
 0x156   :  { %1589 = vmatpush.msrb.mxu0 %v2672_v28  ;;  %1604 = vmatpush.msrb.mxu1 %v2676_v4  ;;  %v592_v28 = vpop.f32.mrf.mxu1  ;;  %v1493_v4 = vld [vmem:[#allocation4 + $0x320] sm:$0xff] }
 0x157   :  { %1543 = vmatpush.msra.mxu2 %v1409_v25  ;;  %1590 = vmatmul.f32.vlgmr.msrb.gmra.mxu0 %v2604_v59  ;;  %v1485_v59 = vld [vmem:[#allocation4 + $0x2e0] sm:$0xff] }
 0x158   :  { %1651 = vmatpush.msrb.mxu3 %v1496_v47  ;;  %1544 = vmatmul.f32.vlgmr.msra.gmra.mxu2 %v2959_v20 }
 0x159   :  { %1605 = vmatpush.msrb.mxu1 %v2686_v38  ;;  %1620 = vmatpush.msrb.mxu2 %v1488_v18  ;;  %v2789_v38 = vld [vmem:[%s2820_s3] ss:$0 sm:$0xff]  ;;  %s1806_s3 = smov [#allocation7]  }
 0x15a   :  { %1652 = vmatpush.msrb.mxu3 %v1495_v23  ;;  %v658_v42 = vpop.f32.mrf.mxu0  ;;  %v567_v61 = vadd.f32 %v2789_v38, %v2763_v45  ;;  %s1673_s12 = sshll.u32 %s1806_s3, 4  ;;  %s1674_s12 = int_to_ptr.vmem [resolvable:$true] %s1673_s12 }
 0x15b   :  { %1606 = vmatpush.msrb.mxu1 %v2691_v24  ;;  %1621 = vmatpush.msrb.mxu2 %v1487_v34  ;;  %v1484_v24 = vld [vmem:[#allocation4 + $0x2d8] sm:$0xff] }
 0x15c   :  { %1653 = vmatpush.msrb.mxu3 %v1494_v37  ;;  %v590_v8 = vadd.f32 %v589_v30, %v567_v61 }
 0x15d   :  { %1607 = vmatpush.msrb.mxu1 %v2696_v51  ;;  %1622 = vmatpush.msrb.mxu2 %v1486_v62  ;;  %v1483_v51 = vld [vmem:[#allocation4 + $0x2d0] sm:$0xff]  ;;  %v638_v12 = vpop.f32.mrf.mxu3 }
 0x15e   :  { %1654 = vmatpush.msrb.mxu3 %v1493_v4  ;;  %v681_v15 = vpop.f32.mrf.mxu1 }
 0x15f   :  { %1608 = vmatpush.msrb.mxu1 %v2701_v48  ;;  %1623 = vmatpush.msrb.mxu2 %v1485_v59  ;;  %v1482_v48 = vld [vmem:[#allocation4 + $0x2c8] sm:$0xff] }
 0x160   :  { %1593 = vmatmul.f32.gmra.mxu0 %v2643_v43  ;;  %1655 = vmatpush.msrb.mxu3 %v1492_v31  ;;  %v615_v43 = vpop.f32.mrf.mxu2 }
 0x161   :  { %1547 = vmatmul.f32.gmra.mxu2 %v2494_v11  ;;  %1609 = vmatpush.msrb.mxu1 %v2708_v3  ;;  %v1481_v11 = vld [vmem:[#allocation4 + $0x2c0] sm:$0xff]  ;;  %v613_v3 = vadd.f32 %v612_v57, %v590_v8 }
 0x162   :  { %1624 = vmatpush.msrb.mxu2 %v1484_v24  ;;  %1656 = vmatpush.msrb.mxu3 %v1491_v54  ;;  %v661_v22 = vpop.f32.mrf.mxu0 }
 0x163   :  { %1610 = vmatpush.msrb.mxu1 %v2715_v49  ;;  %v636_v49 = vadd.f32 %v635_v2, %v613_v3 }
 0x164   :  { %1625 = vmatpush.msrb.mxu2 %v1483_v51  ;;  %1657 = vmatpush.msrb.mxu3 %v1490_v7 }
 0x165   :  { %1611 = vmatpush.msrb.mxu1 %v2720_v19  ;;  %v659_v35 = vadd.f32 %v658_v42, %v636_v49  ;;  %v570_v19 = vadd.f32 %v2789_v38, %v2779_v17  ;;  %v884_v41 = vpop.f32.mrf.mxu3 }
 0x166   :  { %1626 = vmatpush.msrb.mxu2 %v1482_v48  ;;  %1658 = vmatpush.msrb.mxu3 %v1489_v14 }
 0x167   :  { %1612 = vmatpush.msrb.mxu1 %v2725_v58  ;;  %1659 = vmatmul.f32.vlgmr.msrb.gmra.mxu3 %v2757_v33  ;;  %v682_v60 = vadd.f32 %v681_v15, %v659_v35  ;;  %v593_v16 = vadd.f32 %v592_v28, %v570_v19  ;;  %v684_v58 = vpop.f32.mrf.mxu1 }
 0x168   :  { %1627 = vmatpush.msrb.mxu2 %v1481_v11  ;;  %1613 = vmatmul.f32.vlgmr.msrb.gmra.mxu1 %v2682_v26  ;;  %v1476_v26 = vld [vmem:[#allocation4 + $0x298] sm:$0xff] }
 0x169   :  { %v616_v13 = vadd.f32 %v615_v43, %v593_v16 }
 0x16a   :  { %1628 = vmatpush.msrb.mxu2 %v1480_v9  ;;  %v907_v29 = vpop.f32.mrf.mxu0 }
 0x16b   :  { %v639_v33 = vadd.f32 %v638_v12, %v616_v13 }
 0x16c   :  { %1629 = vmatpush.msrb.mxu2 %v1479_v36  ;;  %v704_v39 = vpop.f32.mrf.mxu2 }
 0x16d   :  { %v705_v40 = vadd.f32 %v704_v39, %v682_v60  ;;  %v662_v44 = vadd.f32 %v661_v22, %v639_v33  ;;  %v887_v53 = vpop.f32.mrf.mxu3 }
 0x16e   :  { %1630 = vmatpush.msrb.mxu2 %v1478_v32  ;;  %v888_v23 = vadd.f32 %v2789_v38, %v887_v53 }
 0x16f   :  { %1662 = vmatmul.f32.gmra.mxu3 %v2771_v56  ;;  %710 = vst [vmem:[#allocation7] sm:$0xff] %v705_v40  ;;  %v685_v45 = vadd.f32 %v684_v58, %v662_v44  ;;  %v930_v0 = vpop.f32.mrf.mxu1 }
 0x170   :  { %1631 = vmatpush.msrb.mxu2 %v1477_v5  ;;  %1616 = vmatmul.f32.gmra.mxu1 %v2710_v21  ;;  %v885_v21 = vadd.f32 %v2789_v38, %v884_v41 }
 0x172   :  { %1632 = vmatpush.msrb.mxu2 %v1476_v26  ;;  %v910_v30 = vpop.f32.mrf.mxu0  ;;  %v908_v56 = vadd.f32 %v907_v29, %v885_v21 }
 0x173   :  { %v911_v37 = vadd.f32 %v910_v30, %v888_v23 }
 0x174   :  { %1633 = vmatpush.msrb.mxu2 %v1475_v46  ;;  %v931_v1 = vadd.f32 %v930_v0, %v908_v56 }
 0x175   :  { %v976_v47 = vpop.f32.mrf.mxu3 }
 0x176   :  { %1634 = vmatpush.msrb.mxu2 %v1474_v55  ;;  %v707_v52 = vpop.f32.mrf.mxu2 }
 0x177   :  { %v708_v6 = vadd.f32 %v707_v52, %v685_v45  ;;  %v933_v27 = vpop.f32.mrf.mxu1 }
 0x178   :  { %1635 = vmatpush.msrb.mxu2 %v1473_v10 }
 0x179   :  { %1636 = vmatmul.f32.vlgmr.msrb.gmra.mxu2 %v2732_v50  ;;  %711 = vst [vmem:[#allocation7 + $0x20] sm:$0xff] %v708_v6  ;;  %v934_v50 = vadd.f32 %v933_v27, %v911_v37 }
 0x17a   :  { %v999_v20 = vpop.f32.mrf.mxu0 }
 0x17d   :  { %v979_v2 = vpop.f32.mrf.mxu3 }
 0x181   :  { %1639 = vmatmul.f32.gmra.mxu2 %v2745_v63  ;;  %v953_v25 = vpop.f32.mrf.mxu2 }
 0x182   :  { %v954_v18 = vadd.f32 %v953_v25, %v931_v1  ;;  %v1002_v31 = vpop.f32.mrf.mxu0 }
 0x184   :  { %v977_v17 = vadd.f32 %v976_v47, %v954_v18 }
 0x185   :  { %v1226_v51 = vpop.f32.mrf.mxu3 }
 0x186   :  { %v1000_v34 = vadd.f32 %v999_v20, %v977_v17 }
 0x189   :  { %v1022_v62 = vpop.f32.mrf.mxu1 }
 0x18a   :  { %v1023_v28 = vadd.f32 %v1022_v62, %v1000_v34  ;;  %v956_v57 = vpop.f32.mrf.mxu2 }
 0x18b   :  { %v957_v4 = vadd.f32 %v956_v57, %v934_v50 }
 0x18c   :  { %1029 = vst [vmem:[#allocation7 + $0x8] sm:$0xff] %v1023_v28  ;;  %v1249_v7 = vpop.f32.mrf.mxu0 }
 0x18d   :  { %v980_v59 = vadd.f32 %v979_v2, %v957_v4  ;;  %v1229_v14 = vpop.f32.mrf.mxu3 }
 0x18f   :  { %v1003_v63 = vadd.f32 %v1002_v31, %v980_v59 }
 0x193   :  { %v1025_v42 = vpop.f32.mrf.mxu1 }
 0x194   :  { %v1026_v24 = vadd.f32 %v1025_v42, %v1003_v63 }
 0x195   :  { %v1203_v54 = vpop.f32.mrf.mxu2  ;;  %v1252_v11 = vpop.f32.mrf.mxu0 }
 0x196   :  { %1030 = vst [vmem:[#allocation7 + $0x28] sm:$0xff] %v1026_v24  ;;  %v1204_v61 = vadd.f32 %v2789_v38, %v1203_v54 }
 0x198   :  { %v1227_v15 = vadd.f32 %v1226_v51, %v1204_v61 }
 0x19a   :  { %v1250_v43 = vadd.f32 %v1249_v7, %v1227_v15 }
 0x19e   :  { %v1206_v48 = vpop.f32.mrf.mxu2 }
 0x19f   :  { %v1272_v8 = vpop.f32.mrf.mxu1  ;;  %v1207_v3 = vadd.f32 %v2789_v38, %v1206_v48 }
 0x1a0   :  { %v1273_v12 = vadd.f32 %v1272_v8, %v1250_v43 }
 0x1a1   :  { %v1230_v36 = vadd.f32 %v1229_v14, %v1207_v3 }
 0x1a3   :  { %v1253_v32 = vadd.f32 %v1252_v11, %v1230_v36 }
 0x1a7   :  { %v1275_v19 = vpop.f32.mrf.mxu1 }
 0x1a8   :  { %v1276_v5 = vadd.f32 %v1275_v19, %v1253_v32 }
 0x1b4   :  { %v1318_v49 = vpop.f32.mrf.mxu3 }
 0x1b7   :  { %v1295_v9 = vpop.f32.mrf.mxu2 }
 0x1b8   :  { %v1296_v22 = vadd.f32 %v1295_v9, %v1273_v12 }
 0x1ba   :  { %v1319_v35 = vadd.f32 %v1318_v49, %v1296_v22 }
 0x1bd   :  { %v1341_v60 = vpop.f32.mrf.mxu0  ;;  %v1321_v40 = vpop.f32.mrf.mxu3 }
 0x1be   :  { %v1342_v16 = vadd.f32 %v1341_v60, %v1319_v35 }
 0x1c0   :  { %1348 = vst [vmem:[#allocation7 + $0x10] sm:$0xff] %v1342_v16  ;;  %v1298_v58 = vpop.f32.mrf.mxu2 }
 0x1c1   :  { %v1299_v39 = vadd.f32 %v1298_v58, %v1276_v5 }
 0x1c2   :  { %v1522_v33 = vpop.f32.mrf.mxu1 }
 0x1c3   :  { %v1322_v13 = vadd.f32 %v1321_v40, %v1299_v39  ;;  %v1523_v55 = vadd.f32 %v2789_v38, %v1522_v33 }
 0x1c6   :  { %v1344_v26 = vpop.f32.mrf.mxu0 }
 0x1c7   :  { %v1345_v41 = vadd.f32 %v1344_v26, %v1322_v13 }
 0x1c8   :  { %v1568_v46 = vpop.f32.mrf.mxu3 }
 0x1c9   :  { %1349 = vst [vmem:[#allocation7 + $0x30] sm:$0xff] %v1345_v41 }
 0x1cc   :  { %v1525_v29 = vpop.f32.mrf.mxu1 }
 0x1cd   :  { %v1526_v21 = vadd.f32 %v2789_v38, %v1525_v29 }
 0x1d1   :  { %v1571_v10 = vpop.f32.mrf.mxu3 }
 0x1d4   :  { %v1591_v6 = vpop.f32.mrf.mxu0 }
 0x1db   :  { %v1545_v44 = vpop.f32.mrf.mxu2 }
 0x1dc   :  { %v1546_v45 = vadd.f32 %v1545_v44, %v1523_v55 }
 0x1dd   :  { %v1594_v23 = vpop.f32.mrf.mxu0 }
 0x1de   :  { %v1569_v0 = vadd.f32 %v1568_v46, %v1546_v45 }
 0x1e0   :  { %v1592_v56 = vadd.f32 %v1591_v6, %v1569_v0 }
 0x1e4   :  { %v1548_v52 = vpop.f32.mrf.mxu2 }
 0x1e5   :  { %v1614_v53 = vpop.f32.mrf.mxu1  ;;  %v1549_v30 = vadd.f32 %v1548_v52, %v1526_v21 }
 0x1e6   :  { %v1615_v1 = vadd.f32 %v1614_v53, %v1592_v56 }
 0x1e7   :  { %v1572_v47 = vadd.f32 %v1571_v10, %v1549_v30 }
 0x1e9   :  { %v1595_v34 = vadd.f32 %v1594_v23, %v1572_v47 }
 0x1ea   :  { %v1660_v27 = vpop.f32.mrf.mxu3 }
 0x1ed   :  { %v1617_v20 = vpop.f32.mrf.mxu1 }
 0x1ee   :  { %v1618_v37 = vadd.f32 %v1617_v20, %v1595_v34 }
 0x1f2   :  { %v1663_v62 = vpop.f32.mrf.mxu3 }
 0x1fc   :  { %v1637_v25 = vpop.f32.mrf.mxu2 }
 0x1fd   :  { %v1638_v18 = vadd.f32 %v1637_v25, %v1615_v1 }
 0x1ff   :  { %v1661_v17 = vadd.f32 %v1660_v27, %v1638_v18 }
 0x201   :  { %1667 = vst [vmem:[#allocation7 + $0x18] sm:$0xff] %v1661_v17 }
 0x204   :  { %v1640_v38 = vpop.f32.mrf.mxu2 }
 0x205   :  { %v1641_v50 = vadd.f32 %v1640_v38, %v1618_v37 }
 0x207   :  { %v1664_v28 = vadd.f32 %v1663_v62, %v1641_v50 }
 0x209   :  { %1668 = vst [vmem:[#allocation7 + $0x38] sm:$0xff] %v1664_v28 }
 0x20a   :  { %1681 = dma.vmem_to_hbm [thread:$0]  %s1674_s12, 1024, %s1676_s15, [#allocation6], %s1807_s16, %s1807_s16, %s1808_s17  }
 0x20b   :  { %1801 = dma.done.wait [#allocation6], 1024  }
 0x20c   :  { %1802 = vsyncadd [#allocation6], 4294966272 }
 0x20d   :  { %1686 = vsyncpa [#allocation5], 1 }
 0x20e   :  { %1687 = vsyncpa [#allocation6], 1 }

</bundles_post_ra>
